<compile_context>
chip_gen: v7x
topology: tpu7x:2x2x1
jax: 0.10.0
libtpu: 0.0.40
codegen_flags: <defaults>
</compile_context>

<pallas_src>
import jax
import jax.numpy as jnp
from jax.experimental import pallas as pl
from jax.experimental.pallas import tpu as pltpu


def _round_up(a, b):
    return -(-a // b) * b


def _moe_kernel(x_ref,    # (TM, D_in)        bf16
                w1_ref,   # (D_in, k*D_hid)   bf16   (resident)
                b1_ref,   # (1, k*D_hid)      f32    (resident)
                w2_ref,   # (k*D_hid, D_out)  bf16   (resident, probs pre-folded)
                b2_ref,   # (1, D_out)        f32    (resident, pre-mixed)
                o_ref):   # (TM, D_out)       f32
    # first layer: (TM, D_in) @ (D_in, k*D_hid) -> f32, bias + relu on the VPU in f32
    h = jnp.dot(x_ref[...], w1_ref[...], preferred_element_type=jnp.float32)
    h = jnp.maximum(h + b1_ref[...], 0.0)
    # second layer: (TM, k*D_hid) @ (k*D_hid, D_out); mixing probs already in W2stk
    y = jnp.dot(h.astype(w2_ref.dtype), w2_ref[...],
                preferred_element_type=jnp.float32)
    o_ref[...] = y + b2_ref[...]


def _choose_tm(m_rows, tm_max):
    """Row-tile size: multiple of 8, <= tm_max.  Prefer an even (>=2) number of
    row tiles so the 'parallel' axis splits across v7x's two TensorCores."""
    m8 = _round_up(m_rows, 8)
    tm = min(_round_up(tm_max, 8), m8)
    while tm >= 256 and (-(-m8 // tm)) % 2 == 1:
        tm //= 2
    return tm


def _run_mixture_kernel(x, w1, b1, w2, b2, expert_ids, expert_probs, tm=512):
    """out = sum_j probs[j] * (relu(x @ w1[ids[j]] + b1[ids[j]]) @ w2[ids[j]] + b2[ids[j]])

    expert_ids:   (k,) int32  indices into the expert dimension E
    expert_probs: (k,) f32    mixing weights
    """
    M, D_in = x.shape
    E, _, D_hid = w1.shape
    D_out = w2.shape[-1]
    k = int(expert_ids.shape[0])
    kH = k * D_hid

    # --- gather & fuse the k selected experts once (outside the grid) ---
    probs = expert_probs.astype(jnp.float32)
    ids = expert_ids.astype(jnp.int32)
    w1g = jnp.take(w1, ids, axis=0)                     # (k, D_in, D_hid)
    b1g = jnp.take(b1, ids, axis=0)                     # (k, D_hid)
    w2g = jnp.take(w2, ids, axis=0)                     # (k, D_hid, D_out)
    b2g = jnp.take(b2, ids, axis=0)                     # (k, D_out)

    w1cat = jnp.transpose(w1g, (1, 0, 2)).reshape(D_in, kH).astype(jnp.bfloat16)
    b1cat = b1g.reshape(1, kH).astype(jnp.float32)
    w2stk = (w2g * probs[:, None, None]).reshape(kH, D_out).astype(jnp.bfloat16)
    b2mix = jnp.sum(b2g * probs[:, None], axis=0).reshape(1, D_out).astype(jnp.float32)

    # --- row tiling ---
    TM = _choose_tm(M, tm)
    M_pad = _round_up(M, TM)
    x_p = x if M_pad == M else jnp.pad(x, ((0, M_pad - M), (0, 0)))
    x_p = x_p.astype(jnp.bfloat16)
    n_row_tiles = M_pad // TM

    # --- VMEM budget from the real working set, capped by the device ---
    BF16, F32 = 2, 4
    vmem_est = (2 * BF16 * TM * D_in          # x tile (double-buffered)
                + 2 * F32 * TM * D_out        # out tile (double-buffered)
                + 2 * BF16 * D_in * kH        # W1cat (resident)
                + 2 * BF16 * kH * D_out       # W2stk (resident)
                + 2 * F32 * (kH + D_out))     # biases
    try:
        cap = int(pltpu.get_tpu_info().vmem_capacity_bytes)
    except Exception:
        cap = 64 * 1024 * 1024                # conservative: v7x per-TC VMEM
    cap = max(cap - 16 * 1024 * 1024, 16 * 1024 * 1024)   # compiler headroom
    vmem_limit = int(min(cap, max(2 * vmem_est, 16 * 1024 * 1024)))

    grid_spec = pltpu.PrefetchScalarGridSpec(
        num_scalar_prefetch=0,
        grid=(n_row_tiles,),                              # rows only, "parallel"
        in_specs=[
            pl.BlockSpec((TM, D_in), lambda i: (i, 0)),   # x row tile
            pl.BlockSpec((D_in, kH), lambda i: (0, 0)),   # W1cat (resident)
            pl.BlockSpec((1, kH), lambda i: (0, 0)),      # b1cat (resident)
            pl.BlockSpec((kH, D_out), lambda i: (0, 0)),  # W2stk (resident)
            pl.BlockSpec((1, D_out), lambda i: (0, 0)),   # b2mix (resident)
        ],
        out_specs=pl.BlockSpec((TM, D_out), lambda i: (i, 0)),
    )

    out = pl.pallas_call(
        _moe_kernel,
        out_shape=jax.ShapeDtypeStruct((M_pad, D_out), jnp.float32),
        grid_spec=grid_spec,
        compiler_params=pltpu.CompilerParams(
            dimension_semantics=("parallel",),
            vmem_limit_bytes=vmem_limit),
    )(x_p, w1cat, b1cat, w2stk, b2mix)

    return out[:M] if M_pad != M else out


def mixture_of_extractors_forward(x, params, scaling_params,
                                  option="add_k", k_experts=2, tm=512):
    """Mirrors MixtureOfExtractors.forward for MLP extractors."""
    w1, b1, w2, b2 = params
    E = w1.shape[0]

    if option == "pairwise_TL":
        # out = scaling_params[0] * extractor_0(x)   (no softmax, single return)
        ids = jnp.array([0], dtype=jnp.int32)
        probs = scaling_params[0:1].astype(jnp.float32)
        return _run_mixture_kernel(x, w1, b1, w2, b2, ids, probs, tm=tm)

    elif option == "add_k":
        assert 0 < k_experts <= E
        top_v, top_i = jax.lax.top_k(scaling_params, k_experts)
        top_p = jax.nn.softmax(top_v, axis=0)
        out = _run_mixture_kernel(x, w1, b1, w2, b2,
                                  top_i.astype(jnp.int32), top_p, tm=tm)
        backbone_scores = jnp.zeros((E,), jnp.float32).at[top_i].set(top_p)
        return out, backbone_scores

    # TODO(synk): option='concat' (channel-dim concat of per-expert outputs) not wired up.
    raise NotImplementedError(option)


def _reference_forward(x, params, scaling_params, k_experts):
    """Pure-JAX f32 reference of the 'add_k' path for validation."""
    w1, b1, w2, b2 = params
    E = w1.shape[0]
    top_v, top_i = jax.lax.top_k(scaling_params, k_experts)
    top_p = jax.nn.softmax(top_v, axis=0)

    def expert(e, xx):
        h = jnp.maximum(xx @ w1[e] + b1[e], 0.0)
        return h @ w2[e] + b2[e]

    out = jnp.zeros((x.shape[0], w2.shape[-1]), jnp.float32)
    for j in range(k_experts):
        out = out + top_p[j] * expert(top_i[j], x)
    scores = jnp.zeros((E,), jnp.float32).at[top_i].set(top_p)
    return out, scores


if __name__ == "__main__":
    # small, lane-dense deterministic setup
    B, S = 2, 256                     # batch, sequence -> M = 512 rows
    D_in, D_hid, D_out = 128, 256, 128
    E, K = 4, 2                       # num extractors, k_experts

    key = jax.random.PRNGKey(0)
    kx, k1, k2, k3, k4 = jax.random.split(key, 5)

    x = jax.random.normal(kx, (B * S, D_in), jnp.float32)
    w1 = 0.05 * jax.random.normal(k1, (E, D_in, D_hid), jnp.float32)
    b1 = 0.01 * jax.random.normal(k2, (E, D_hid), jnp.float32)
    w2 = 0.05 * jax.random.normal(k3, (E, D_hid, D_out), jnp.float32)
    b2 = 0.01 * jax.random.normal(k4, (E, D_out), jnp.float32)
    params = (w1, b1, w2, b2)

    # nn.Parameter(torch.ones(len(extractors)))
    scaling_params = jnp.ones((E,), jnp.float32)

    out, scores = mixture_of_extractors_forward(
        x, params, scaling_params, option="add_k", k_experts=K)
    out = jax.block_until_ready(out)
    scores = jax.block_until_ready(scores)

    ref_out, ref_scores = _reference_forward(x, params, scaling_params, K)
    assert out.shape == (B * S, D_out)
    assert scores.shape == (E,)
    # tolerance covers the bf16 input/MXU pass vs the f32 XLA reference
    assert jnp.allclose(out, ref_out, atol=3e-2, rtol=3e-2), \
        float(jnp.max(jnp.abs(out - ref_out)))
    assert jnp.allclose(scores, ref_scores, atol=1e-6)

    print("KERNEL_OK")
</pallas_src>

<mosaic_0001>
module attributes {stable_mosaic.version = 11 : i64} {
  func.func @_moe_kernel(%arg0: i32, %arg1: memref<256x128xbf16, #tpu.memory_space<vmem>>, %arg2: memref<128x512xbf16, #tpu.memory_space<vmem>>, %arg3: memref<1x512xf32, #tpu.memory_space<vmem>>, %arg4: memref<512x128xbf16, #tpu.memory_space<vmem>>, %arg5: memref<1x128xf32, #tpu.memory_space<vmem>>, %arg6: memref<256x128xf32, #tpu.memory_space<vmem>>) attributes {dimension_semantics = [#tpu.dimension_semantics<parallel>], iteration_bounds = array<i64: 2>, scalar_prefetch = 0 : i64, scratch_operands = 0 : i64, tpu.core_type = #tpu.core_type<tc>, window_params = [{transform_indices = @transform_0, window_bounds = array<i64: 256, 128>}, {pipeline_mode = #tpu.pipeline_mode<synchronous>, transform_indices = @transform_1, window_bounds = array<i64: 128, 512>}, {pipeline_mode = #tpu.pipeline_mode<synchronous>, transform_indices = @transform_2, window_bounds = array<i64: 1, 512>}, {pipeline_mode = #tpu.pipeline_mode<synchronous>, transform_indices = @transform_3, window_bounds = array<i64: 512, 128>}, {pipeline_mode = #tpu.pipeline_mode<synchronous>, transform_indices = @transform_4, window_bounds = array<i64: 1, 128>}, {transform_indices = @transform_5, window_bounds = array<i64: 256, 128>}]} {
    %c0 = arith.constant 0 : index
    %c0_0 = arith.constant 0 : index
    %0 = vector.load %arg1[%c0, %c0_0] : memref<256x128xbf16, #tpu.memory_space<vmem>>, vector<256x128xbf16>
    %c0_1 = arith.constant 0 : index
    %c0_2 = arith.constant 0 : index
    %1 = vector.load %arg2[%c0_1, %c0_2] : memref<128x512xbf16, #tpu.memory_space<vmem>>, vector<128x512xbf16>
    %cst = arith.constant dense<0.000000e+00> : vector<256x512xf32>
    %2 = tpu.matmul %0, %1, %cst {dimension_numbers = #tpu.dot_dimension_numbers<[1], [0], [0], [1], [0, 0, 1, 1], [], []>} : vector<256x128xbf16>, vector<128x512xbf16>, vector<256x512xf32> -> vector<256x512xf32>
    %c0_3 = arith.constant 0 : index
    %c0_4 = arith.constant 0 : index
    %3 = vector.load %arg3[%c0_3, %c0_4] : memref<1x512xf32, #tpu.memory_space<vmem>>, vector<1x512xf32>
    %4 = vector.broadcast %3 : vector<1x512xf32> to vector<256x512xf32>
    %5 = arith.addf %2, %4 : vector<256x512xf32>
    %cst_5 = arith.constant 0.000000e+00 : f32
    %6 = vector.broadcast %cst_5 : f32 to vector<256x512xf32>
    %7 = arith.maximumf %5, %6 : vector<256x512xf32>
    %8 = arith.truncf %7 : vector<256x512xf32> to vector<256x512xbf16>
    %c0_6 = arith.constant 0 : index
    %c0_7 = arith.constant 0 : index
    %9 = vector.load %arg4[%c0_6, %c0_7] : memref<512x128xbf16, #tpu.memory_space<vmem>>, vector<512x128xbf16>
    %cst_8 = arith.constant dense<0.000000e+00> : vector<256x128xf32>
    %10 = tpu.matmul %8, %9, %cst_8 {dimension_numbers = #tpu.dot_dimension_numbers<[1], [0], [0], [1], [0, 0, 1, 1], [], []>} : vector<256x512xbf16>, vector<512x128xbf16>, vector<256x128xf32> -> vector<256x128xf32>
    %c0_9 = arith.constant 0 : index
    %c0_10 = arith.constant 0 : index
    %11 = vector.load %arg5[%c0_9, %c0_10] : memref<1x128xf32, #tpu.memory_space<vmem>>, vector<1x128xf32>
    %12 = vector.broadcast %11 : vector<1x128xf32> to vector<256x128xf32>
    %13 = arith.addf %10, %12 : vector<256x128xf32>
    %c0_11 = arith.constant 0 : index
    %c0_12 = arith.constant 0 : index
    %14 = vector.load %arg6[%c0_11, %c0_12] : memref<256x128xf32, #tpu.memory_space<vmem>>, vector<256x128xf32>
    tpu.vector_store %arg6[%c0_11, %c0_12], %13 {strides = array<i32>} : memref<256x128xf32, #tpu.memory_space<vmem>>, vector<256x128xf32>,
    return
  }
  func.func @transform_0(%arg0: i32) -> (i32, i32) {
    %c0_i32 = arith.constant 0 : i32
    %c0_i32_0 = arith.constant 0 : i32
    return %arg0, %c0_i32 : i32, i32
  }
  func.func @transform_1(%arg0: i32) -> (i32, i32) {
    %c0_i32 = arith.constant 0 : i32
    %c0_i32_0 = arith.constant 0 : i32
    %c0_i32_1 = arith.constant 0 : i32
    return %c0_i32, %c0_i32_0 : i32, i32
  }
  func.func @transform_2(%arg0: i32) -> (i32, i32) {
    %c0_i32 = arith.constant 0 : i32
    %c0_i32_0 = arith.constant 0 : i32
    %c0_i32_1 = arith.constant 0 : i32
    return %c0_i32, %c0_i32_0 : i32, i32
  }
  func.func @transform_3(%arg0: i32) -> (i32, i32) {
    %c0_i32 = arith.constant 0 : i32
    %c0_i32_0 = arith.constant 0 : i32
    %c0_i32_1 = arith.constant 0 : i32
    return %c0_i32, %c0_i32_0 : i32, i32
  }
  func.func @transform_4(%arg0: i32) -> (i32, i32) {
    %c0_i32 = arith.constant 0 : i32
    %c0_i32_0 = arith.constant 0 : i32
    %c0_i32_1 = arith.constant 0 : i32
    return %c0_i32, %c0_i32_0 : i32, i32
  }
  func.func @transform_5(%arg0: i32) -> (i32, i32) {
    %c0_i32 = arith.constant 0 : i32
    %c0_i32_0 = arith.constant 0 : i32
    return %arg0, %c0_i32 : i32, i32
  }
}

</mosaic_0001>

<bundles_post_ra>
// kernel: tpu_custom_call.1
= control target key start
LH: loop header
LB: loop body
LE: loop exit
PB: predicated region body
PF: predicated region fallthrough
CT: control target
= control target key end

     0   :  { %10 = vsyncpa [#allocation3], 0  ;;  %s3114_s0 = inlined_call_operand.hbm [shape: bf16[512,128], index: 0, kind: input, shape index: {}]   ;;  %s3115_s1 = inlined_call_operand.hbm [shape: bf16[128,512], index: 1, kind: input, shape index: {}]   ;;  %s3116_s2 = inlined_call_operand.vmem [shape: f32[1,512], index: 2, kind: input, shape index: {}]   ;;  %s3117_s3 = inlined_call_operand.hbm [shape: bf16[512,128], index: 3, kind: input, shape index: {}]   ;;  %s3118_s4 = inlined_call_operand.vmem [shape: f32[1,128], index: 4, kind: input, shape index: {}]   ;;  %s3119_s5 = inlined_call_operand.hbm [shape: f32[512,128], index: 5, kind: output, shape index: {}]  }
   0x1   :  { %12 = vsyncpa [#allocation3 + $0x1], 0 }
   0x2   :  { %13 = vsyncpa [#allocation6], 0 }
   0x3   :  { %14 = vsyncpa [#allocation4], 0 }
   0x4   :  { %16 = vsyncpa [#allocation4 + $0x1], 0  ;;  %s2612_s18 = smov 0   ;;  %s2614_s19 = smov 0  }
   0x5   :  { %s2616_s20 = smov 0   ;;  %s2618_s21 = smov 0  }
   0x6 LB: > { %s2633_s22 = sadd.s32 4294967295, %s2569_s21   ;;  %s1918_s23 = sadd.s32 4294967294, %s2569_s21   ;;  %s2569_s21 = sphi %s2618_s21, %s3139_s21   ;;  %s2565_s20 = sphi %s2616_s20, %s3138_s20   ;;  %s2561_s19 = sphi %s2614_s19, %s3137_s19   ;;  %s2557_s18 = sphi %s2612_s18, %s3136_s18  }
   0x7   : > { %p42_p0 = scmp.ne.s32.totalorder %s2561_s19, %s2557_s18  ;;  %p3120_p1 = scmp.eq.s32.totalorder %s2633_s22, 0 }
   0x8   : > { %p156_p3 = scmp.eq.s32.totalorder %s1918_s23, 1  ;;  %p1919_p5 = scmp.ge.s32.totalorder %s2569_s21, 1 }
   0x9   : > { %p2642_p4 = por %p3120_p1, %p42_p0  ;;  %p163_p7 = scmp.lt.s32.totalorder %s2569_s21, 3 }
   0xa   : > { %p2647_p6 = por %p156_p3, %p42_p0  ;;  %s2571_s27 = smov [#allocation5]  }
   0xb   : > { %s3123_s24 = scalar_select %p2642_p4, 1, 0 }
   0xc   : > { %s3124_s25 = scalar_select %p2647_p6, 1, 0 }
   0xd   : > { %p2652_p8 = pnand %p1919_p5, %p163_p7  ;;  %s175_s28 = sshll.u32 %s2571_s27, 4  ;;  %s2656_s28 = int_to_ptr.vmem [resolvable:$true] %s175_s28 }
   0xe   : > { %s2572_s30 = smov [#allocation7]   ;;  %s2413_s9 = scalar_lea.hbm %s3115_s1, 4096 }
   0xf   : > { %p2255_p9 = pneg %p2652_p8  ;;  %s191_s6 = sshll.u32 %s2572_s30, 4  ;;  %s2667_s6 = int_to_ptr.vmem [resolvable:$true] %s191_s6 }
  0x10   : > { %p2414_p12 = scmp.ne.s32.totalorder %s3115_s1, %s2413_s9  ;;  %p2420_p5 = scmp.lt.u32.totalorder %s2413_s9, %s3115_s1 }
  0x11   : > { %p2663_p11 = pnand %p2255_p9, %p3120_p1 }
  0x13   : > { %p2415_p13 = pneg %p2663_p11 }
  0x15   : > { %p2416_p0 = pnand %p2415_p13, %p2414_p12 }
  0x17   : > { %p2417_p3 = pneg %p2416_p0 }
  0x19   : > { %p2422_p7 = pnand %p2420_p5, %p2417_p3 }
  0x1b   : > { %2425 = shalt.err (!%p2422_p7)
}
  0x1c   : > { %s2426_s14 = scalar_lea.vmem %s2656_s28, 4096  ;;  %p2434_p2 = scmp.lt.s32.totalorder %s2656_s28, %s2656_s28 }
  0x1d   : > { %p2427_p9 = scmp.ne.s32.totalorder %s2656_s28, %s2426_s14  ;;  %p2435_p12 = scmp.lt.s32.totalorder %s2426_s14, %s2426_s14 }
  0x1f   : > { %p2429_p10 = pnand %p2427_p9, %p2415_p13  ;;  %p2436_p0 = por %p2435_p12, %p2434_p2 }
  0x21   : > { %p2430_p1 = pneg %p2429_p10 }
  0x23   : > { %p2437_p6 = pnand %p2436_p0, %p2430_p1 }
  0x25   : > { %2440 = shalt.err (!%p2437_p6)
}
  0x26   : > { %s2573_s15 = smov 256   ;;  %s2574_s16 = smov 16  }
  0x27   : > { %2258 = dma.hbm_to_vmem [thread:$0]  (!%p2663_p11), %s3115_s1, 4096, %s2656_s28, [#allocation6], %s2573_s15, %s2573_s15, %s2574_s16  }
  0x28   : > { %s2441_s7 = scalar_lea.hbm %s3117_s3, 4096 }
  0x29   : > { %p2442_p2 = scmp.ne.s32.totalorder %s3117_s3, %s2441_s7  ;;  %p2448_p10 = scmp.lt.u32.totalorder %s2441_s7, %s3117_s3 }
  0x2b   : > { %p2444_p1 = pnand %p2442_p2, %p2415_p13 }
  0x2d   : > { %p2445_p6 = pneg %p2444_p1 }
  0x2f   : > { %p2450_p3 = pnand %p2448_p10, %p2445_p6 }
  0x31   : > { %2453 = shalt.err (!%p2450_p3)
}
  0x32   : > { %s2454_s28 = scalar_lea.vmem %s2667_s6, 4096  ;;  %p2462_p12 = scmp.lt.s32.totalorder %s2667_s6, %s2667_s6 }
  0x33   : > { %p2455_p5 = scmp.ne.s32.totalorder %s2667_s6, %s2454_s28  ;;  %p2463_p0 = scmp.lt.s32.totalorder %s2454_s28, %s2454_s28 }
  0x35   : > { %p2457_p7 = pnand %p2455_p5, %p2415_p13  ;;  %p2464_p2 = por %p2463_p0, %p2462_p12 }
  0x37   : > { %p2458_p9 = pneg %p2457_p7 }
  0x39   : > { %p2465_p1 = pnand %p2464_p2, %p2458_p9 }
  0x3b   : > { %2468 = shalt.err (!%p2465_p1)
}
  0x3c   : > { %s2575_s12 = smov 64   ;;  %s2576_s13 = smov 4  }
  0x3d   : > { %2261 = dma.hbm_to_vmem [thread:$0]  (!%p2663_p11), %s3117_s3, 4096, %s2667_s6, [#allocation6], %s2575_s12, %s2575_s12, %s2576_s13  }
  0x3e   : > { %s2725_s16 = sadd.s32 1, %s2569_s21   ;;  %s29_s23 = sadd.s32 1, %s2565_s20 }
  0x3f   : > { %s26_s17 = ssub.s32 %s2569_s21, %s2725_s16  ;;  %p36_p6 = scmp.ne.s32.totalorder %s2565_s20, %s2561_s19 }
  0x40   : > { %p27_p13 = scmp.eq.s32.totalorder %s26_s17, 0  ;;  %p37_p10 = scmp.eq.s32.totalorder %s2569_s21, 0 }
  0x41   : > { %p3127_p5 = scmp.eq.s32.totalorder %s2633_s22, 1  ;;  %p2272_p9 = scmp.lt.s32.totalorder %s2569_s21, 2 }
  0x42   : > { %s2734_s27 = scalar_select %p27_p13, %s2565_s20, %s29_s23  }
  0x43   : > { %p38_p3 = por %p37_p10, %p36_p6  ;;  %p2738_p7 = por %p3127_p5, %p36_p6 }
  0x44   : > { %s208_s30 = sand.u32 1, %s2565_s20   ;;  %s2017_s6 = sshll.u32 %s2569_s21, 11 }
  0x45   : > { %s3128_s29 = scalar_select %p2738_p7, 1, 0 }
  0x46   : > { %s1923_s7 = sshll.u32 %s208_s30, 7  ;;  %s2748_s10 = scalar_lea.hbm %s3114_s0, %s2017_s6 }
  0x47   : > { %s212_s11 = scalar_lea.vmem [#allocation2], %s1923_s7  ;;  %p2752_p11 = pnand %p2272_p9, %p38_p3 }
  0x48   : > { %s219_s28 = sshll.u32 %s212_s11, 4  ;;  %s2756_s15 = scalar_lea.sflag [#allocation3], %s208_s30  ;;  %s2750_s28 = int_to_ptr.vmem [resolvable:$true] %s219_s28 }
  0x49   : > { %s2469_s17 = scalar_lea.hbm %s2748_s10, 2048  ;;  %p2471_p0 = pneg %p2752_p11 }
  0x4a   : > { %p2470_p12 = scmp.ne.s32.totalorder %s2748_s10, %s2469_s17  ;;  %s2474_s6 = scalar_lea.hbm %s3114_s0, 4096 }
  0x4b   : > { %p2475_p13 = scmp.lt.u32.totalorder %s2748_s10, %s3114_s0  ;;  %p2476_p6 = scmp.lt.u32.totalorder %s2474_s6, %s2469_s17 }
  0x4c   : > { %p2472_p2 = pnand %p2471_p0, %p2470_p12  ;;  %p2478_p3 = scmp.lt.u32.totalorder %s2469_s17, %s2748_s10 }
  0x4d   : > { %p2477_p10 = por %p2476_p6, %p2475_p13 }
  0x4e   : > { %p2473_p1 = pneg %p2472_p2 }
  0x4f   : > { %p2479_p5 = por %p2478_p3, %p2477_p10 }
  0x51   : > { %p2480_p9 = pnand %p2479_p5, %p2473_p1 }
  0x53   : > { %2483 = shalt.err (!%p2480_p9)
}
  0x54   : > { %s2484_s30 = scalar_lea.vmem %s2750_s28, 2048  ;;  %s2577_s11 = smov [#allocation2]  }
  0x55   : > { %p2485_p12 = scmp.ne.s32.totalorder %s2750_s28, %s2484_s30  ;;  %s2489_s23 = sshll.u32 %s2577_s11, 4  ;;  %s2490_s23 = int_to_ptr.vmem [resolvable:$false] %s2489_s23 }
  0x56   : > { %s2491_s7 = scalar_lea.vmem %s2490_s23, 4096  ;;  %p2492_p4 = scmp.lt.s32.totalorder %s2750_s28, %s2490_s23 }
  0x57   : > { %p2487_p2 = pnand %p2485_p12, %p2471_p0  ;;  %p2493_p13 = scmp.lt.s32.totalorder %s2491_s7, %s2484_s30 }
  0x59   : > { %p2488_p7 = pneg %p2487_p2  ;;  %p2494_p6 = por %p2493_p13, %p2492_p4 }
  0x5b   : > { %p2495_p10 = pnand %p2494_p6, %p2488_p7 }
  0x5d   : > { %2498 = shalt.err (!%p2495_p10)
}
  0x5e   : > { %2265 = dma.hbm_to_vmem [thread:$0]  (!%p2752_p11), %s2748_s10, 2048, %s2750_s28, %s2756_s15, %s2575_s12, %s2575_s12, %s2576_s13  }
  0x5f   : > { %231 = sbr.rel (%p2652_p8) target bundleno = 718 (0x2ce), region = 40  ;;  %s2790_s17 = sand.u32 (!%p2652_p8), 1, %s2561_s19  }
  0x60   : > { %s1927_s6 = sshll.u32 (!%p2652_p8), %s2790_s17, 7  ;;  %s234_s8 = scalar_lea.sflag (!%p2652_p8), [#allocation3], %s2790_s17 }
  0x61   : > { %s2794_s9 = scalar_lea.vmem (!%p2652_p8), [#allocation2], %s1927_s6  ;;  %p3130_p4 = scmp.ne.s32.totalorder (!%p2652_p8), %s3123_s24, 0 }
  0x66   : > { %2544 = dma.done.wait (%p3130_p4), %s234_s8, 2048  }
  0x67   : > { %2546 = vsyncadd (%p3130_p4), %s234_s8, 4294965248  ;;  %p3131_p7 = scmp.eq.s32.totalorder %s2633_s22, 0 }
  0x69   : > { %2548 = dma.done.wait (%p3131_p7), [#allocation6], 8192   ;;  %p3132_p8 = pmov %p3131_p7 }
  0x6a   : > { %v2578_v0 = vmov 0   ;;  %v2317_v1 = vld [vmem:[#allocation5 + $0x4] ss:$16 sps:$4 sm:$0xff]   ;;  %v2319_v2 = vld [vmem:[#allocation5 + $0xc] ss:$16 sps:$4 sm:$0xff]   ;;  %s1930_s10 = sshll.u32 %s2790_s17, 8 }
  0x6b   : > { %2550 = vsyncadd (%p3132_p8), [#allocation6], 4294959104  ;;  %649 = vmatprep.mubr.bf16.mxu0 %v2578_v0  ;;  %842 = vmatprep.mubr.bf16.mxu1 %v2578_v0  ;;  %v2321_v3 = vld [vmem:[#allocation5] ss:$16 sps:$4 sm:$0xff]   ;;  %v2322_v4 = vld [vmem:[#allocation5 + $0x8] ss:$16 sps:$4 sm:$0xff]  }
  0x6c   : > { %617 = vmatprep.subr.bf16.mxu0 %v2317_v1  ;;  %810 = vmatprep.subr.bf16.mxu1 %v2319_v2  ;;  %v2323_v5 = vld [vmem:[#allocation5 + $0x24] ss:$16 sps:$4 sm:$0xff]   ;;  %v2325_v6 = vld [vmem:[#allocation5 + $0x2c] ss:$16 sps:$4 sm:$0xff]   ;;  %v2327_v7 = vld [vmem:[#allocation5 + $0x20] ss:$16 sps:$4 sm:$0xff]  }
  0x6d   : > { %618 = vmatpush1.bf16.msra.mxu0 %v2321_v3  ;;  %811 = vmatpush1.bf16.msra.mxu1 %v2322_v4  ;;  %v2328_v8 = vld [vmem:[#allocation5 + $0x28] ss:$16 sps:$4 sm:$0xff]   ;;  %v2329_v9 = vld [vmem:[#allocation5 + $0x44] ss:$16 sps:$4 sm:$0xff]   ;;  %v2331_v10 = vld [vmem:[#allocation5 + $0x4c] ss:$16 sps:$4 sm:$0xff]  }
  0x6e   : > { %619 = vmatprep.subr.bf16.mxu0 %v2323_v5  ;;  %812 = vmatprep.subr.bf16.mxu1 %v2325_v6  ;;  %v2333_v11 = vld [vmem:[#allocation5 + $0x40] ss:$16 sps:$4 sm:$0xff]   ;;  %v2334_v12 = vld [vmem:[#allocation5 + $0x48] ss:$16 sps:$4 sm:$0xff]   ;;  %v2335_v13 = vld [vmem:[#allocation5 + $0x64] ss:$16 sps:$4 sm:$0xff]  }
  0x6f   : > { %v2337_v14 = vld [vmem:[#allocation5 + $0x6c] ss:$16 sps:$4 sm:$0xff]   ;;  %v2339_v15 = vld [vmem:[#allocation5 + $0x60] ss:$16 sps:$4 sm:$0xff]   ;;  %v2340_v16 = vld [vmem:[#allocation5 + $0x68] ss:$16 sps:$4 sm:$0xff]  }
  0x70   : > { %v2341_v17 = vld [vmem:[#allocation5 + $0x84] ss:$16 sps:$4 sm:$0xff]   ;;  %v2343_v18 = vld [vmem:[#allocation5 + $0x8c] ss:$16 sps:$4 sm:$0xff]   ;;  %v2345_v19 = vld [vmem:[#allocation5 + $0x80] ss:$16 sps:$4 sm:$0xff]  }
  0x71   : > { %620 = vmatpush1.bf16.msra.mxu0 %v2327_v7  ;;  %813 = vmatpush1.bf16.msra.mxu1 %v2328_v8  ;;  %v2346_v20 = vld [vmem:[#allocation5 + $0x88] ss:$16 sps:$4 sm:$0xff]   ;;  %v2347_v21 = vld [vmem:[#allocation5 + $0xa4] ss:$16 sps:$4 sm:$0xff]   ;;  %v2349_v22 = vld [vmem:[#allocation5 + $0xac] ss:$16 sps:$4 sm:$0xff]  }
  0x72   : > { %621 = vmatprep.subr.bf16.mxu0 %v2329_v9  ;;  %814 = vmatprep.subr.bf16.mxu1 %v2331_v10  ;;  %v2351_v23 = vld [vmem:[#allocation5 + $0xa0] ss:$16 sps:$4 sm:$0xff]   ;;  %v2352_v24 = vld [vmem:[#allocation5 + $0xa8] ss:$16 sps:$4 sm:$0xff]   ;;  %v2353_v25 = vld [vmem:[#allocation5 + $0xc4] ss:$16 sps:$4 sm:$0xff]  }
  0x73   : > { %v2355_v26 = vld [vmem:[#allocation5 + $0xcc] ss:$16 sps:$4 sm:$0xff]   ;;  %v2357_v27 = vld [vmem:[#allocation5 + $0xc0] ss:$16 sps:$4 sm:$0xff]   ;;  %v2358_v28 = vld [vmem:[#allocation5 + $0xc8] ss:$16 sps:$4 sm:$0xff]  }
  0x74   : > { %v2359_v29 = vld [vmem:[#allocation5 + $0xe4] ss:$16 sps:$4 sm:$0xff]   ;;  %v2361_v30 = vld [vmem:[#allocation5 + $0xec] ss:$16 sps:$4 sm:$0xff]   ;;  %v2363_v31 = vld [vmem:[#allocation5 + $0xe0] ss:$16 sps:$4 sm:$0xff]  }
  0x75   : > { %622 = vmatpush1.bf16.msra.mxu0 %v2333_v11  ;;  %815 = vmatpush1.bf16.msra.mxu1 %v2334_v12  ;;  %v2364_v32 = vld [vmem:[#allocation5 + $0xe8] ss:$16 sps:$4 sm:$0xff]   ;;  %v2365_v33 = vld [vmem:[%s2794_s9] sm:$0xff]   ;;  %v2367_v43 = vld [vmem:[%s2794_s9 + $0x10] sm:$0xff]   ;;  %s2999_s28 = scalar_lea.vmem [#allocation8], %s1930_s10  ;;  %s2018_s14 = sshll.u32 %s2633_s22, 12 }
  0x76   : > { %623 = vmatprep.subr.bf16.mxu0 %v2335_v13  ;;  %816 = vmatprep.subr.bf16.mxu1 %v2337_v14  ;;  %v2377_v34 = vld [vmem:[#allocation7 + $0x40] sm:$0xff]   ;;  %v2366_v38 = vld [vmem:[%s2794_s9 + $0x8] sm:$0xff]   ;;  %v2389_v44 = vld [vmem:[#allocation7 + $0x50] sm:$0xff]   ;;  %s1826_s15 = sshll.u32 %s2999_s28, 4  ;;  %s3066_s23 = scalar_lea.hbm %s3119_s5, %s2018_s14  ;;  %s3068_s15 = int_to_ptr.vmem [resolvable:$true] %s1826_s15 }
  0x77   : > { %v2378_v35 = vld [vmem:[#allocation7] sm:$0xff]   ;;  %v2383_v39 = vld [vmem:[#allocation7 + $0x48] sm:$0xff]   ;;  %v2390_v45 = vld [vmem:[#allocation7 + $0x10] sm:$0xff]   ;;  %s1813_s7 = scalar_lea.sflag [#allocation4], %s2790_s17  ;;  %s2499_s6 = scalar_lea.vmem %s3068_s15, 4096 }
  0x78   : > { %v2379_v36 = vld [vmem:[#allocation7 + $0xc0] sm:$0xff]   ;;  %v2384_v40 = vld [vmem:[#allocation7 + $0x8] sm:$0xff]   ;;  %v2391_v46 = vld [vmem:[#allocation7 + $0xd0] sm:$0xff]   ;;  %p2500_p11 = scmp.ne.s32.totalorder %s3068_s15, %s2499_s6  ;;  %p3133_p0 = scmp.ne.s32.totalorder %s3128_s29, 0 }
  0x79   : > { %624 = vmatpush1.bf16.msra.mxu0 %v2339_v15  ;;  %817 = vmatpush1.bf16.msra.mxu1 %v2340_v16  ;;  %v2381_v37 = vld [vmem:[#allocation7 + $0x80] sm:$0xff]   ;;  %v2385_v41 = vld [vmem:[#allocation7 + $0xc8] sm:$0xff]   ;;  %v2392_v47 = vld [vmem:[#allocation7 + $0x90] sm:$0xff]   ;;  %s2579_s22 = smov [#allocation8]  }
  0x7a   : > { %625 = vmatprep.subr.bf16.mxu0 %v2341_v17  ;;  %818 = vmatprep.subr.bf16.mxu1 %v2343_v18  ;;  %v2387_v42 = vld [vmem:[#allocation7 + $0x88] sm:$0xff]   ;;  %v2393_v48 = vld [vmem:[#allocation7 + $0x58] sm:$0xff]   ;;  %v2397_v53 = vld [vmem:[#allocation7 + $0x60] sm:$0xff]   ;;  %v341_v18 = vlaneseq  ;;  %p2501_p1 = pnand %p2500_p11, %p3133_p0  ;;  %s2503_s8 = sshll.u32 %s2579_s22, 4  ;;  %s2504_s8 = int_to_ptr.vmem [resolvable:$false] %s2503_s8 }
  0x7b   : > { %v2394_v49 = vld [vmem:[#allocation7 + $0x18] sm:$0xff]   ;;  %v2398_v54 = vld [vmem:[#allocation7 + $0x20] sm:$0xff]   ;;  %v2401_v57 = vld [vmem:[#allocation7 + $0x68] sm:$0xff]   ;;  %p2506_p5 = scmp.lt.s32.totalorder %s3068_s15, %s2504_s8 }
  0x7c   : > { %v2395_v50 = vld [vmem:[#allocation7 + $0xd8] sm:$0xff]   ;;  %v2399_v55 = vld [vmem:[#allocation7 + $0xe0] sm:$0xff]   ;;  %v2402_v58 = vld [vmem:[#allocation7 + $0x28] sm:$0xff]   ;;  %p2502_p3 = pneg %p2501_p1 }
  0x7d   : > { %626 = vmatpush1.bf16.msra.mxu0 %v2345_v19  ;;  %819 = vmatpush1.bf16.msra.mxu1 %v2346_v20  ;;  %v2368_v51 = vld [vmem:[%s2794_s9 + $0x18] sm:$0xff]   ;;  %v2400_v56 = vld [vmem:[#allocation7 + $0xa0] sm:$0xff]   ;;  %v2403_v59 = vld [vmem:[#allocation7 + $0xe8] sm:$0xff]   ;;  %v342_v19 = vshrl.u32 %v341_v18, 7 }
  0x7e   : > { %627 = vmatprep.subr.bf16.mxu0 %v2347_v21  ;;  %820 = vmatprep.subr.bf16.mxu1 %v2349_v22  ;;  %v2396_v52 = vld [vmem:[#allocation7 + $0x98] sm:$0xff]   ;;  %v2369_v60 = vld [vmem:[%s2794_s9 + $0x20] sm:$0xff]   ;;  %v2404_v61 = vld [vmem:[#allocation7 + $0xa8] sm:$0xff]  }
  0x7f   : > { %v2405_v62 = vld [vmem:[#allocation7 + $0x70] sm:$0xff]   ;;  %v2409_v3 = vld [vmem:[#allocation7 + $0x78] sm:$0xff]   ;;  %v2370_v7 = vld [vmem:[%s2794_s9 + $0x28] sm:$0xff]   ;;  %v343_v20 = vsub.s32 0, %v342_v19  ;;  %v351_v21 = vsub.s32 2, %v342_v19 }
  0x80   : > { %v2406_v63 = vld [vmem:[#allocation7 + $0x30] sm:$0xff]   ;;  %v2410_v4 = vld [vmem:[#allocation7 + $0x38] sm:$0xff]   ;;  %v2373_v10 = vld [vmem:[%s2794_s9 + $0x40] sm:$0xff]  }
  0x81   : > { %628 = vmatpush1.bf16.msra.mxu0 %v2351_v23  ;;  %821 = vmatpush1.bf16.msra.mxu1 %v2352_v24  ;;  %v2407_v1 = vld [vmem:[#allocation7 + $0xf0] sm:$0xff]   ;;  %v2411_v5 = vld [vmem:[#allocation7 + $0xf8] sm:$0xff]   ;;  %v2374_v11 = vld [vmem:[%s2794_s9 + $0x48] sm:$0xff]   ;;  %v347_v23 = vsub.s32 1, %v342_v19  ;;  %v355_v24 = vsub.s32 3, %v342_v19 }
  0x82   : > { %629 = vmatprep.subr.bf16.mxu0 %v2353_v25  ;;  %822 = vmatprep.subr.bf16.mxu1 %v2355_v26  ;;  %v2408_v2 = vld [vmem:[#allocation7 + $0xb0] sm:$0xff]   ;;  %v2412_v6 = vld [vmem:[#allocation7 + $0xb8] sm:$0xff]   ;;  %v2380_v14 = vld [vmem:[%s2794_s9 + $0x60] sm:$0xff]  }
  0x83   : > { %v2371_v8 = vld [vmem:[%s2794_s9 + $0x30] sm:$0xff]   ;;  %v2372_v9 = vld [vmem:[%s2794_s9 + $0x38] sm:$0xff]   ;;  %v2382_v15 = vld [vmem:[%s2794_s9 + $0x68] sm:$0xff]  }
  0x84   : > { %v2375_v12 = vld [vmem:[%s2794_s9 + $0x50] sm:$0xff]   ;;  %v2376_v13 = vld [vmem:[%s2794_s9 + $0x58] sm:$0xff]   ;;  %v339_v22 = vld [vmem:[%s3116_s2] sm:$0xf] }
  0x85   : > { %630 = vmatpush1.bf16.msra.mxu0 %v2357_v27  ;;  %823 = vmatpush1.bf16.msra.mxu1 %v2358_v28  ;;  %v2386_v16 = vld [vmem:[%s2794_s9 + $0x70] sm:$0xff]   ;;  %v2388_v17 = vld [vmem:[%s2794_s9 + $0x78] sm:$0xff]   ;;  %v2855_v25 = vrot.slane %v339_v22, %v343_v20  ;;  %v2857_v26 = vrot.slane %v339_v22, %v351_v21  ;;  %v2859_v27 = vrot.slane %v339_v22, %v347_v23  ;;  %s2505_s9 = scalar_lea.vmem %s2504_s8, 8192 }
  0x86   : > { %631 = vmatprep.subr.bf16.mxu0 %v2359_v29  ;;  %824 = vmatprep.subr.bf16.mxu1 %v2361_v30  ;;  %p2507_p9 = scmp.lt.s32.totalorder %s2505_s9, %s2499_s6 }
  0x88   : > { %p2508_p12 = por %p2507_p9, %p2506_p5 }
  0x89   : > { %632 = vmatpush1.bf16.msra.mxu0 %v2363_v31  ;;  %825 = vmatpush1.bf16.msra.mxu1 %v2364_v32 }
  0x8a   : > { %2019 = vmatprep.subr.bf16.mxu0 %v2377_v34  ;;  %2131 = vmatprep.subr.bf16.mxu1 %v2379_v36  ;;  %p2509_p2 = pnand %p2508_p12, %p2502_p3 }
  0x8c   : > { %650 = vmatmul.mubr.bf16.vlgmr.msra.gmra.mrb[0].mxu0 %v2365_v33  ;;  %843 = vmatmul.mubr.bf16.vlgmr.msra.gmra.mrb[0].mxu1 %v2365_v33 }
  0x8d   : > { %659 = vmatprep.mubr.bf16.mxu0 %v2578_v0  ;;  %852 = vmatprep.mubr.bf16.mxu1 %v2578_v0 }
  0x8e   : > { %2020 = vmatpush3.bf16.msra.mxu0 %v2378_v35  ;;  %2132 = vmatpush3.bf16.msra.mxu1 %v2381_v37 }
  0x8f   : > { %2021 = vmatprep.subr.bf16.mxu0 %v2383_v39  ;;  %2133 = vmatprep.subr.bf16.mxu1 %v2385_v41 }
  0x92   : > { %2022 = vmatpush3.bf16.msra.mxu0 %v2384_v40  ;;  %2134 = vmatpush3.bf16.msra.mxu1 %v2387_v42 }
  0x93   : > { %2023 = vmatprep.subr.bf16.mxu0 %v2389_v44  ;;  %2135 = vmatprep.subr.bf16.mxu1 %v2391_v46 }
  0x94   : > { %660 = vmatmul.mubr.bf16.gmra.mrb[4].mxu0 %v2366_v38  ;;  %853 = vmatmul.mubr.bf16.gmra.mrb[4].mxu1 %v2366_v38 }
  0x95   : > { %669 = vmatprep.mubr.bf16.mxu0 %v2578_v0  ;;  %862 = vmatprep.mubr.bf16.mxu1 %v2578_v0 }
  0x96   : > { %2024 = vmatpush3.bf16.msra.mxu0 %v2390_v45  ;;  %2136 = vmatpush3.bf16.msra.mxu1 %v2392_v47 }
  0x97   : > { %2025 = vmatprep.subr.bf16.mxu0 %v2393_v48  ;;  %2137 = vmatprep.subr.bf16.mxu1 %v2395_v50 }
  0x9a   : > { %2026 = vmatpush3.bf16.msra.mxu0 %v2394_v49  ;;  %2138 = vmatpush3.bf16.msra.mxu1 %v2396_v52 }
  0x9b   : > { %2027 = vmatprep.subr.bf16.mxu0 %v2397_v53  ;;  %2139 = vmatprep.subr.bf16.mxu1 %v2399_v55 }
  0x9c   : > { %670 = vmatmul.mubr.bf16.gmra.mrb[8].mxu0 %v2367_v43  ;;  %863 = vmatmul.mubr.bf16.gmra.mrb[8].mxu1 %v2367_v43 }
  0x9d   : > { %679 = vmatprep.mubr.bf16.mxu0 %v2578_v0  ;;  %872 = vmatprep.mubr.bf16.mxu1 %v2578_v0 }
  0x9e   : > { %2028 = vmatpush3.bf16.msra.mxu0 %v2398_v54  ;;  %2140 = vmatpush3.bf16.msra.mxu1 %v2400_v56 }
  0x9f   : > { %2029 = vmatprep.subr.bf16.mxu0 %v2401_v57  ;;  %2141 = vmatprep.subr.bf16.mxu1 %v2403_v59 }
  0xa2   : > { %2030 = vmatpush3.bf16.msra.mxu0 %v2402_v58  ;;  %2142 = vmatpush3.bf16.msra.mxu1 %v2404_v61 }
  0xa3   : > { %2031 = vmatprep.subr.bf16.mxu0 %v2405_v62  ;;  %2143 = vmatprep.subr.bf16.mxu1 %v2407_v1 }
  0xa4   : > { %680 = vmatmul.mubr.bf16.gmra.mrb[12].mxu0 %v2368_v51  ;;  %873 = vmatmul.mubr.bf16.gmra.mrb[12].mxu1 %v2368_v51 }
  0xa5   : > { %689 = vmatprep.mubr.bf16.mxu0 %v2578_v0  ;;  %882 = vmatprep.mubr.bf16.mxu1 %v2578_v0 }
  0xa6   : > { %2032 = vmatpush3.bf16.msra.mxu0 %v2406_v63  ;;  %2144 = vmatpush3.bf16.msra.mxu1 %v2408_v2 }
  0xa7   : > { %2033 = vmatprep.subr.bf16.mxu0 %v2409_v3  ;;  %2145 = vmatprep.subr.bf16.mxu1 %v2411_v5 }
  0xaa   : > { %2034 = vmatpush3.bf16.msra.mxu0 %v2410_v4  ;;  %2146 = vmatpush3.bf16.msra.mxu1 %v2412_v6 }
  0xac   : > { %690 = vmatmul.mubr.bf16.gmra.mrb[16].mxu0 %v2369_v60  ;;  %883 = vmatmul.mubr.bf16.gmra.mrb[16].mxu1 %v2369_v60 }
  0xad   : > { %699 = vmatprep.mubr.bf16.mxu0 %v2578_v0  ;;  %892 = vmatprep.mubr.bf16.mxu1 %v2578_v0 }
  0xb4   : > { %700 = vmatmul.mubr.bf16.gmra.mrb[20].mxu0 %v2370_v7  ;;  %893 = vmatmul.mubr.bf16.gmra.mrb[20].mxu1 %v2370_v7 }
  0xb5   : > { %709 = vmatprep.mubr.bf16.mxu0 %v2578_v0  ;;  %902 = vmatprep.mubr.bf16.mxu1 %v2578_v0 }
  0xbc   : > { %710 = vmatmul.mubr.bf16.gmra.mrb[24].mxu0 %v2371_v8  ;;  %903 = vmatmul.mubr.bf16.gmra.mrb[24].mxu1 %v2371_v8 }
  0xbd   : > { %719 = vmatprep.mubr.bf16.mxu0 %v2578_v0  ;;  %912 = vmatprep.mubr.bf16.mxu1 %v2578_v0 }
  0xc4   : > { %720 = vmatmul.mubr.bf16.gmra.mrb[28].mxu0 %v2372_v9  ;;  %913 = vmatmul.mubr.bf16.gmra.mrb[28].mxu1 %v2372_v9 }
  0xc5   : > { %729 = vmatprep.mubr.bf16.mxu0 %v2578_v0  ;;  %922 = vmatprep.mubr.bf16.mxu1 %v2578_v0 }
  0xcc   : > { %730 = vmatmul.mubr.bf16.gmra.mrb[32].mxu0 %v2373_v10  ;;  %923 = vmatmul.mubr.bf16.gmra.mrb[32].mxu1 %v2373_v10 }
  0xcd   : > { %739 = vmatprep.mubr.bf16.mxu0 %v2578_v0  ;;  %932 = vmatprep.mubr.bf16.mxu1 %v2578_v0 }
  0xd4   : > { %740 = vmatmul.mubr.bf16.gmra.mrb[36].mxu0 %v2374_v11  ;;  %933 = vmatmul.mubr.bf16.gmra.mrb[36].mxu1 %v2374_v11 }
  0xd5   : > { %749 = vmatprep.mubr.bf16.mxu0 %v2578_v0  ;;  %942 = vmatprep.mubr.bf16.mxu1 %v2578_v0 }
  0xdc   : > { %750 = vmatmul.mubr.bf16.gmra.mrb[40].mxu0 %v2375_v12  ;;  %943 = vmatmul.mubr.bf16.gmra.mrb[40].mxu1 %v2375_v12 }
  0xdd   : > { %759 = vmatprep.mubr.bf16.mxu0 %v2578_v0  ;;  %952 = vmatprep.mubr.bf16.mxu1 %v2578_v0 }
  0xe4   : > { %760 = vmatmul.mubr.bf16.gmra.mrb[44].mxu0 %v2376_v13  ;;  %953 = vmatmul.mubr.bf16.gmra.mrb[44].mxu1 %v2376_v13 }
  0xe5   : > { %769 = vmatprep.mubr.bf16.mxu0 %v2578_v0  ;;  %962 = vmatprep.mubr.bf16.mxu1 %v2578_v0 }
  0xec   : > { %770 = vmatmul.mubr.bf16.gmra.mrb[48].mxu0 %v2380_v14  ;;  %963 = vmatmul.mubr.bf16.gmra.mrb[48].mxu1 %v2380_v14 }
  0xed   : > { %779 = vmatprep.mubr.bf16.mxu0 %v2578_v0  ;;  %972 = vmatprep.mubr.bf16.mxu1 %v2578_v0 }
  0xf4   : > { %780 = vmatmul.mubr.bf16.gmra.mrb[52].mxu0 %v2382_v15  ;;  %973 = vmatmul.mubr.bf16.gmra.mrb[52].mxu1 %v2382_v15 }
  0xf5   : > { %789 = vmatprep.mubr.bf16.mxu0 %v2578_v0  ;;  %982 = vmatprep.mubr.bf16.mxu1 %v2578_v0 }
  0xfc   : > { %790 = vmatmul.mubr.bf16.gmra.mrb[56].mxu0 %v2386_v16  ;;  %983 = vmatmul.mubr.bf16.gmra.mrb[56].mxu1 %v2386_v16 }
  0xfd   : > { %799 = vmatprep.mubr.bf16.mxu0 %v2578_v0  ;;  %992 = vmatprep.mubr.bf16.mxu1 %v2578_v0  ;;  %v2861_v0 = vrot.slane %v339_v22, %v355_v24 }
 0x104   : > { %800 = vmatmul.mubr.bf16.gmra.mrb[60].mxu0 %v2388_v17  ;;  %993 = vmatmul.mubr.bf16.gmra.mrb[60].mxu1 %v2388_v17 }
 0x15f   : > { %v651_v28 = vpop.f32.mrb[0].mxu0  ;;  %v844_v29 = vpop.f32.mrb[0].mxu1 }
 0x160   : > { %v652_v30 = vadd.f32 %v651_v28, %v2855_v25  ;;  %v845_v31 = vadd.f32 %v844_v29, %v2857_v26  ;;  %v653_v32 = vpop.f32.mrb[1].mxu0  ;;  %v846_v33 = vpop.f32.mrb[1].mxu1 }
 0x161   : > { %v654_v34 = vadd.f32 %v653_v32, %v2859_v27  ;;  %v847_v35 = vadd.f32 %v846_v33, %v2861_v0  ;;  %v655_v36 = vpop.f32.mrb[2].mxu0  ;;  %v848_v37 = vpop.f32.mrb[2].mxu1 }
 0x162   : > { %v1005_v38 = vmax.f32 %v845_v31, 0.0  ;;  %v656_v39 = vadd.f32 %v655_v36, %v2855_v25  ;;  %v849_v40 = vadd.f32 %v848_v37, %v2857_v26  ;;  %v657_v41 = vpop.f32.mrb[3].mxu0  ;;  %v850_v42 = vpop.f32.mrb[3].mxu1  ;;  %v1003_v46 = vmax.f32 %v652_v30, 0.0 }
 0x163   : > { %v1006_v43 = vmax.f32 %v847_v35, 0.0  ;;  %v658_v44 = vadd.f32 %v657_v41, %v2859_v27  ;;  %v851_v45 = vadd.f32 %v850_v42, %v2861_v0  ;;  %v1004_v49 = vmax.f32 %v654_v34, 0.0 }
 0x164   : > { %v1007_v47 = vmax.f32 %v656_v39, 0.0  ;;  %v1009_v48 = vmax.f32 %v849_v40, 0.0 }
 0x165   : > { %v1008_v50 = vmax.f32 %v658_v44, 0.0  ;;  %v1010_v51 = vmax.f32 %v851_v45, 0.0 }
 0x166   : > { %v1131_v52 = vpack.c.bf16 %v1007_v47, %v1003_v46  ;;  %v1133_v53 = vpack.c.bf16 %v1009_v48, %v1005_v38 }
 0x167   : > { %v1132_v54 = vpack.c.bf16 %v1008_v50, %v1004_v49  ;;  %v1134_v55 = vpack.c.bf16 %v1010_v51, %v1006_v43  ;;  %v661_v56 = vpop.f32.mrb[4].mxu0  ;;  %v854_v57 = vpop.f32.mrb[4].mxu1 }
 0x168   : > { %v662_v58 = vadd.f32 %v661_v56, %v2855_v25  ;;  %v855_v59 = vadd.f32 %v854_v57, %v2857_v26  ;;  %v663_v60 = vpop.f32.mrb[5].mxu0  ;;  %v856_v61 = vpop.f32.mrb[5].mxu1 }
 0x169   : > { %v664_v62 = vadd.f32 %v663_v60, %v2859_v27  ;;  %v857_v63 = vadd.f32 %v856_v61, %v2861_v0  ;;  %v665_v1 = vpop.f32.mrb[6].mxu0  ;;  %v858_v2 = vpop.f32.mrb[6].mxu1  ;;  %1490 = vmatprep.mubr.bf16.mxu0 %v1132_v54  ;;  %1651 = vmatprep.mubr.bf16.mxu1 %v1134_v55 }
 0x16a   : > { %v1013_v3 = vmax.f32 %v855_v59, 0.0  ;;  %v666_v4 = vadd.f32 %v665_v1, %v2855_v25  ;;  %v859_v5 = vadd.f32 %v858_v2, %v2857_v26  ;;  %v667_v6 = vpop.f32.mrb[7].mxu0  ;;  %v860_v7 = vpop.f32.mrb[7].mxu1  ;;  %1491 = vmatmul.mubr.bf16.vlgmr.msra.gmra.mrb[64].mxu0 %v1131_v52  ;;  %1652 = vmatmul.mubr.bf16.vlgmr.msra.gmra.mrb[64].mxu1 %v1133_v53  ;;  %v1011_v11 = vmax.f32 %v662_v58, 0.0 }
 0x16b   : > { %v1014_v8 = vmax.f32 %v857_v63, 0.0  ;;  %v668_v9 = vadd.f32 %v667_v6, %v2859_v27  ;;  %v861_v10 = vadd.f32 %v860_v7, %v2861_v0  ;;  %v1012_v14 = vmax.f32 %v664_v62, 0.0 }
 0x16c   : > { %v1015_v12 = vmax.f32 %v666_v4, 0.0  ;;  %v1017_v13 = vmax.f32 %v859_v5, 0.0 }
 0x16d   : > { %v1016_v15 = vmax.f32 %v668_v9, 0.0  ;;  %v1018_v16 = vmax.f32 %v861_v10, 0.0 }
 0x16e   : > { %v1135_v17 = vpack.c.bf16 %v1015_v12, %v1011_v11  ;;  %v1137_v18 = vpack.c.bf16 %v1017_v13, %v1013_v3 }
 0x16f   : > { %v1136_v19 = vpack.c.bf16 %v1016_v15, %v1012_v14  ;;  %v1138_v20 = vpack.c.bf16 %v1018_v16, %v1014_v8  ;;  %v671_v21 = vpop.f32.mrb[8].mxu0  ;;  %v864_v22 = vpop.f32.mrb[8].mxu1 }
 0x170   : > { %v672_v23 = vadd.f32 %v671_v21, %v2855_v25  ;;  %v865_v24 = vadd.f32 %v864_v22, %v2857_v26  ;;  %v673_v28 = vpop.f32.mrb[9].mxu0  ;;  %v866_v29 = vpop.f32.mrb[9].mxu1 }
 0x171   : > { %v674_v30 = vadd.f32 %v673_v28, %v2859_v27  ;;  %v867_v31 = vadd.f32 %v866_v29, %v2861_v0  ;;  %v675_v32 = vpop.f32.mrb[10].mxu0  ;;  %v868_v33 = vpop.f32.mrb[10].mxu1  ;;  %1498 = vmatprep.mubr.bf16.mxu0 %v1136_v19  ;;  %1659 = vmatprep.mubr.bf16.mxu1 %v1138_v20 }
 0x172   : > { %v1021_v34 = vmax.f32 %v865_v24, 0.0  ;;  %v676_v35 = vadd.f32 %v675_v32, %v2855_v25  ;;  %v869_v36 = vadd.f32 %v868_v33, %v2857_v26  ;;  %v677_v37 = vpop.f32.mrb[11].mxu0  ;;  %v870_v38 = vpop.f32.mrb[11].mxu1  ;;  %1499 = vmatmul.mubr.bf16.gmra.mrb[68].mxu0 %v1135_v17  ;;  %1660 = vmatmul.mubr.bf16.gmra.mrb[68].mxu1 %v1137_v18  ;;  %v1019_v42 = vmax.f32 %v672_v23, 0.0 }
 0x173   : > { %v1022_v39 = vmax.f32 %v867_v31, 0.0  ;;  %v678_v40 = vadd.f32 %v677_v37, %v2859_v27  ;;  %v871_v41 = vadd.f32 %v870_v38, %v2861_v0  ;;  %v1020_v45 = vmax.f32 %v674_v30, 0.0 }
 0x174   : > { %v1023_v43 = vmax.f32 %v676_v35, 0.0  ;;  %v1025_v44 = vmax.f32 %v869_v36, 0.0 }
 0x175   : > { %v1024_v46 = vmax.f32 %v678_v40, 0.0  ;;  %v1026_v47 = vmax.f32 %v871_v41, 0.0 }
 0x176   : > { %v1139_v48 = vpack.c.bf16 %v1023_v43, %v1019_v42  ;;  %v1141_v49 = vpack.c.bf16 %v1025_v44, %v1021_v34 }
 0x177   : > { %v1140_v50 = vpack.c.bf16 %v1024_v46, %v1020_v45  ;;  %v1142_v51 = vpack.c.bf16 %v1026_v47, %v1022_v39  ;;  %v681_v52 = vpop.f32.mrb[12].mxu0  ;;  %v874_v53 = vpop.f32.mrb[12].mxu1 }
 0x178   : > { %v682_v54 = vadd.f32 %v681_v52, %v2855_v25  ;;  %v875_v55 = vadd.f32 %v874_v53, %v2857_v26  ;;  %v683_v56 = vpop.f32.mrb[13].mxu0  ;;  %v876_v57 = vpop.f32.mrb[13].mxu1 }
 0x179   : > { %v684_v58 = vadd.f32 %v683_v56, %v2859_v27  ;;  %v877_v59 = vadd.f32 %v876_v57, %v2861_v0  ;;  %v685_v60 = vpop.f32.mrb[14].mxu0  ;;  %v878_v61 = vpop.f32.mrb[14].mxu1  ;;  %1506 = vmatprep.mubr.bf16.mxu0 %v1140_v50  ;;  %1667 = vmatprep.mubr.bf16.mxu1 %v1142_v51 }
 0x17a   : > { %v1029_v62 = vmax.f32 %v875_v55, 0.0  ;;  %v686_v63 = vadd.f32 %v685_v60, %v2855_v25  ;;  %v879_v1 = vadd.f32 %v878_v61, %v2857_v26  ;;  %v687_v2 = vpop.f32.mrb[15].mxu0  ;;  %v880_v3 = vpop.f32.mrb[15].mxu1  ;;  %1507 = vmatmul.mubr.bf16.gmra.mrb[72].mxu0 %v1139_v48  ;;  %1668 = vmatmul.mubr.bf16.gmra.mrb[72].mxu1 %v1141_v49  ;;  %v1027_v7 = vmax.f32 %v682_v54, 0.0 }
 0x17b   : > { %v1030_v4 = vmax.f32 %v877_v59, 0.0  ;;  %v688_v5 = vadd.f32 %v687_v2, %v2859_v27  ;;  %v881_v6 = vadd.f32 %v880_v3, %v2861_v0  ;;  %v1028_v10 = vmax.f32 %v684_v58, 0.0 }
 0x17c   : > { %v1031_v8 = vmax.f32 %v686_v63, 0.0  ;;  %v1033_v9 = vmax.f32 %v879_v1, 0.0 }
 0x17d   : > { %v1032_v11 = vmax.f32 %v688_v5, 0.0  ;;  %v1034_v12 = vmax.f32 %v881_v6, 0.0 }
 0x17e   : > { %v1143_v13 = vpack.c.bf16 %v1031_v8, %v1027_v7  ;;  %v1145_v14 = vpack.c.bf16 %v1033_v9, %v1029_v62 }
 0x17f   : > { %v1144_v15 = vpack.c.bf16 %v1032_v11, %v1028_v10  ;;  %v1146_v16 = vpack.c.bf16 %v1034_v12, %v1030_v4  ;;  %v691_v17 = vpop.f32.mrb[16].mxu0  ;;  %v884_v18 = vpop.f32.mrb[16].mxu1 }
 0x180   : > { %v692_v19 = vadd.f32 %v691_v17, %v2855_v25  ;;  %v885_v20 = vadd.f32 %v884_v18, %v2857_v26  ;;  %v693_v21 = vpop.f32.mrb[17].mxu0  ;;  %v886_v22 = vpop.f32.mrb[17].mxu1 }
 0x181   : > { %v694_v23 = vadd.f32 %v693_v21, %v2859_v27  ;;  %v887_v24 = vadd.f32 %v886_v22, %v2861_v0  ;;  %v695_v28 = vpop.f32.mrb[18].mxu0  ;;  %v888_v29 = vpop.f32.mrb[18].mxu1  ;;  %1514 = vmatprep.mubr.bf16.mxu0 %v1144_v15  ;;  %1675 = vmatprep.mubr.bf16.mxu1 %v1146_v16 }
 0x182   : > { %v1037_v30 = vmax.f32 %v885_v20, 0.0  ;;  %v696_v31 = vadd.f32 %v695_v28, %v2855_v25  ;;  %v889_v32 = vadd.f32 %v888_v29, %v2857_v26  ;;  %v697_v33 = vpop.f32.mrb[19].mxu0  ;;  %v890_v34 = vpop.f32.mrb[19].mxu1  ;;  %1515 = vmatmul.mubr.bf16.gmra.mrb[76].mxu0 %v1143_v13  ;;  %1676 = vmatmul.mubr.bf16.gmra.mrb[76].mxu1 %v1145_v14  ;;  %v1035_v38 = vmax.f32 %v692_v19, 0.0 }
 0x183   : > { %v1038_v35 = vmax.f32 %v887_v24, 0.0  ;;  %v698_v36 = vadd.f32 %v697_v33, %v2859_v27  ;;  %v891_v37 = vadd.f32 %v890_v34, %v2861_v0  ;;  %v1036_v41 = vmax.f32 %v694_v23, 0.0 }
 0x184   : > { %v1039_v39 = vmax.f32 %v696_v31, 0.0  ;;  %v1041_v40 = vmax.f32 %v889_v32, 0.0 }
 0x185   : > { %v1040_v42 = vmax.f32 %v698_v36, 0.0  ;;  %v1042_v43 = vmax.f32 %v891_v37, 0.0 }
 0x186   : > { %v1147_v44 = vpack.c.bf16 %v1039_v39, %v1035_v38  ;;  %v1149_v45 = vpack.c.bf16 %v1041_v40, %v1037_v30 }
 0x187   : > { %v1148_v46 = vpack.c.bf16 %v1040_v42, %v1036_v41  ;;  %v1150_v47 = vpack.c.bf16 %v1042_v43, %v1038_v35  ;;  %v701_v48 = vpop.f32.mrb[20].mxu0  ;;  %v894_v49 = vpop.f32.mrb[20].mxu1 }
 0x188   : > { %v702_v50 = vadd.f32 %v701_v48, %v2855_v25  ;;  %v895_v51 = vadd.f32 %v894_v49, %v2857_v26  ;;  %v703_v52 = vpop.f32.mrb[21].mxu0  ;;  %v896_v53 = vpop.f32.mrb[21].mxu1 }
 0x189   : > { %v704_v54 = vadd.f32 %v703_v52, %v2859_v27  ;;  %v897_v55 = vadd.f32 %v896_v53, %v2861_v0  ;;  %v705_v56 = vpop.f32.mrb[22].mxu0  ;;  %v898_v57 = vpop.f32.mrb[22].mxu1  ;;  %1522 = vmatprep.mubr.bf16.mxu0 %v1148_v46  ;;  %1683 = vmatprep.mubr.bf16.mxu1 %v1150_v47 }
 0x18a   : > { %v1045_v58 = vmax.f32 %v895_v51, 0.0  ;;  %v706_v59 = vadd.f32 %v705_v56, %v2855_v25  ;;  %v899_v60 = vadd.f32 %v898_v57, %v2857_v26  ;;  %v707_v61 = vpop.f32.mrb[23].mxu0  ;;  %v900_v62 = vpop.f32.mrb[23].mxu1  ;;  %1523 = vmatmul.mubr.bf16.gmra.mrb[80].mxu0 %v1147_v44  ;;  %1684 = vmatmul.mubr.bf16.gmra.mrb[80].mxu1 %v1149_v45  ;;  %v1043_v3 = vmax.f32 %v702_v50, 0.0 }
 0x18b   : > { %v1046_v63 = vmax.f32 %v897_v55, 0.0  ;;  %v708_v1 = vadd.f32 %v707_v61, %v2859_v27  ;;  %v901_v2 = vadd.f32 %v900_v62, %v2861_v0  ;;  %v1044_v6 = vmax.f32 %v704_v54, 0.0 }
 0x18c   : > { %v1047_v4 = vmax.f32 %v706_v59, 0.0  ;;  %v1049_v5 = vmax.f32 %v899_v60, 0.0 }
 0x18d   : > { %v1048_v7 = vmax.f32 %v708_v1, 0.0  ;;  %v1050_v8 = vmax.f32 %v901_v2, 0.0 }
 0x18e   : > { %v1151_v9 = vpack.c.bf16 %v1047_v4, %v1043_v3  ;;  %v1153_v10 = vpack.c.bf16 %v1049_v5, %v1045_v58 }
 0x18f   : > { %v1152_v11 = vpack.c.bf16 %v1048_v7, %v1044_v6  ;;  %v1154_v12 = vpack.c.bf16 %v1050_v8, %v1046_v63  ;;  %v711_v13 = vpop.f32.mrb[24].mxu0  ;;  %v904_v14 = vpop.f32.mrb[24].mxu1 }
 0x190   : > { %v712_v15 = vadd.f32 %v711_v13, %v2855_v25  ;;  %v905_v16 = vadd.f32 %v904_v14, %v2857_v26  ;;  %v713_v17 = vpop.f32.mrb[25].mxu0  ;;  %v906_v18 = vpop.f32.mrb[25].mxu1 }
 0x191   : > { %v714_v19 = vadd.f32 %v713_v17, %v2859_v27  ;;  %v907_v20 = vadd.f32 %v906_v18, %v2861_v0  ;;  %v715_v21 = vpop.f32.mrb[26].mxu0  ;;  %v908_v22 = vpop.f32.mrb[26].mxu1  ;;  %1530 = vmatprep.mubr.bf16.mxu0 %v1152_v11  ;;  %1691 = vmatprep.mubr.bf16.mxu1 %v1154_v12 }
 0x192   : > { %v1053_v23 = vmax.f32 %v905_v16, 0.0  ;;  %v716_v24 = vadd.f32 %v715_v21, %v2855_v25  ;;  %v909_v28 = vadd.f32 %v908_v22, %v2857_v26  ;;  %v717_v29 = vpop.f32.mrb[27].mxu0  ;;  %v910_v30 = vpop.f32.mrb[27].mxu1  ;;  %1531 = vmatmul.mubr.bf16.gmra.mrb[84].mxu0 %v1151_v9  ;;  %1692 = vmatmul.mubr.bf16.gmra.mrb[84].mxu1 %v1153_v10  ;;  %v1051_v34 = vmax.f32 %v712_v15, 0.0 }
 0x193   : > { %v1054_v31 = vmax.f32 %v907_v20, 0.0  ;;  %v718_v32 = vadd.f32 %v717_v29, %v2859_v27  ;;  %v911_v33 = vadd.f32 %v910_v30, %v2861_v0  ;;  %v1052_v37 = vmax.f32 %v714_v19, 0.0 }
 0x194   : > { %v1055_v35 = vmax.f32 %v716_v24, 0.0  ;;  %v1057_v36 = vmax.f32 %v909_v28, 0.0 }
 0x195   : > { %v1056_v38 = vmax.f32 %v718_v32, 0.0  ;;  %v1058_v39 = vmax.f32 %v911_v33, 0.0 }
 0x196   : > { %v1155_v40 = vpack.c.bf16 %v1055_v35, %v1051_v34  ;;  %v1157_v41 = vpack.c.bf16 %v1057_v36, %v1053_v23 }
 0x197   : > { %v1156_v42 = vpack.c.bf16 %v1056_v38, %v1052_v37  ;;  %v1158_v43 = vpack.c.bf16 %v1058_v39, %v1054_v31  ;;  %v721_v44 = vpop.f32.mrb[28].mxu0  ;;  %v914_v45 = vpop.f32.mrb[28].mxu1 }
 0x198   : > { %v722_v46 = vadd.f32 %v721_v44, %v2855_v25  ;;  %v915_v47 = vadd.f32 %v914_v45, %v2857_v26  ;;  %v723_v48 = vpop.f32.mrb[29].mxu0  ;;  %v916_v49 = vpop.f32.mrb[29].mxu1 }
 0x199   : > { %v724_v50 = vadd.f32 %v723_v48, %v2859_v27  ;;  %v917_v51 = vadd.f32 %v916_v49, %v2861_v0  ;;  %v725_v52 = vpop.f32.mrb[30].mxu0  ;;  %v918_v53 = vpop.f32.mrb[30].mxu1  ;;  %1538 = vmatprep.mubr.bf16.mxu0 %v1156_v42  ;;  %1699 = vmatprep.mubr.bf16.mxu1 %v1158_v43 }
 0x19a   : > { %v1061_v54 = vmax.f32 %v915_v47, 0.0  ;;  %v726_v55 = vadd.f32 %v725_v52, %v2855_v25  ;;  %v919_v56 = vadd.f32 %v918_v53, %v2857_v26  ;;  %v727_v57 = vpop.f32.mrb[31].mxu0  ;;  %v920_v58 = vpop.f32.mrb[31].mxu1  ;;  %1539 = vmatmul.mubr.bf16.gmra.mrb[88].mxu0 %v1155_v40  ;;  %1700 = vmatmul.mubr.bf16.gmra.mrb[88].mxu1 %v1157_v41  ;;  %v1059_v62 = vmax.f32 %v722_v46, 0.0 }
 0x19b   : > { %v1062_v59 = vmax.f32 %v917_v51, 0.0  ;;  %v728_v60 = vadd.f32 %v727_v57, %v2859_v27  ;;  %v921_v61 = vadd.f32 %v920_v58, %v2861_v0  ;;  %v1060_v2 = vmax.f32 %v724_v50, 0.0 }
 0x19c   : > { %v1063_v63 = vmax.f32 %v726_v55, 0.0  ;;  %v1065_v1 = vmax.f32 %v919_v56, 0.0 }
 0x19d   : > { %v1064_v3 = vmax.f32 %v728_v60, 0.0  ;;  %v1066_v4 = vmax.f32 %v921_v61, 0.0 }
 0x19e   : > { %v1159_v5 = vpack.c.bf16 %v1063_v63, %v1059_v62  ;;  %v1161_v6 = vpack.c.bf16 %v1065_v1, %v1061_v54 }
 0x19f   : > { %v1160_v7 = vpack.c.bf16 %v1064_v3, %v1060_v2  ;;  %v1162_v8 = vpack.c.bf16 %v1066_v4, %v1062_v59  ;;  %v731_v9 = vpop.f32.mrb[32].mxu0  ;;  %v924_v10 = vpop.f32.mrb[32].mxu1 }
 0x1a0   : > { %v732_v11 = vadd.f32 %v731_v9, %v2855_v25  ;;  %v925_v12 = vadd.f32 %v924_v10, %v2857_v26  ;;  %v733_v13 = vpop.f32.mrb[33].mxu0  ;;  %v926_v14 = vpop.f32.mrb[33].mxu1 }
 0x1a1   : > { %v734_v15 = vadd.f32 %v733_v13, %v2859_v27  ;;  %v927_v16 = vadd.f32 %v926_v14, %v2861_v0  ;;  %v735_v17 = vpop.f32.mrb[34].mxu0  ;;  %v928_v18 = vpop.f32.mrb[34].mxu1  ;;  %1546 = vmatprep.mubr.bf16.mxu0 %v1160_v7  ;;  %1707 = vmatprep.mubr.bf16.mxu1 %v1162_v8 }
 0x1a2   : > { %v1069_v19 = vmax.f32 %v925_v12, 0.0  ;;  %v736_v20 = vadd.f32 %v735_v17, %v2855_v25  ;;  %v929_v21 = vadd.f32 %v928_v18, %v2857_v26  ;;  %v737_v22 = vpop.f32.mrb[35].mxu0  ;;  %v930_v23 = vpop.f32.mrb[35].mxu1  ;;  %1547 = vmatmul.mubr.bf16.gmra.mrb[92].mxu0 %v1159_v5  ;;  %1708 = vmatmul.mubr.bf16.gmra.mrb[92].mxu1 %v1161_v6  ;;  %v1067_v30 = vmax.f32 %v732_v11, 0.0 }
 0x1a3   : > { %v1070_v24 = vmax.f32 %v927_v16, 0.0  ;;  %v738_v28 = vadd.f32 %v737_v22, %v2859_v27  ;;  %v931_v29 = vadd.f32 %v930_v23, %v2861_v0  ;;  %v1068_v33 = vmax.f32 %v734_v15, 0.0 }
 0x1a4   : > { %v1071_v31 = vmax.f32 %v736_v20, 0.0  ;;  %v1073_v32 = vmax.f32 %v929_v21, 0.0 }
 0x1a5   : > { %v1072_v34 = vmax.f32 %v738_v28, 0.0  ;;  %v1074_v35 = vmax.f32 %v931_v29, 0.0 }
 0x1a6   : > { %v1163_v36 = vpack.c.bf16 %v1071_v31, %v1067_v30  ;;  %v1165_v37 = vpack.c.bf16 %v1073_v32, %v1069_v19 }
 0x1a7   : > { %v1164_v38 = vpack.c.bf16 %v1072_v34, %v1068_v33  ;;  %v1166_v39 = vpack.c.bf16 %v1074_v35, %v1070_v24  ;;  %v741_v40 = vpop.f32.mrb[36].mxu0  ;;  %v934_v41 = vpop.f32.mrb[36].mxu1 }
 0x1a8   : > { %v742_v42 = vadd.f32 %v741_v40, %v2855_v25  ;;  %v935_v43 = vadd.f32 %v934_v41, %v2857_v26  ;;  %v743_v44 = vpop.f32.mrb[37].mxu0  ;;  %v936_v45 = vpop.f32.mrb[37].mxu1 }
 0x1a9   : > { %v744_v46 = vadd.f32 %v743_v44, %v2859_v27  ;;  %v937_v47 = vadd.f32 %v936_v45, %v2861_v0  ;;  %v745_v48 = vpop.f32.mrb[38].mxu0  ;;  %v938_v49 = vpop.f32.mrb[38].mxu1  ;;  %1554 = vmatprep.mubr.bf16.mxu0 %v1164_v38  ;;  %1715 = vmatprep.mubr.bf16.mxu1 %v1166_v39 }
 0x1aa   : > { %v1077_v50 = vmax.f32 %v935_v43, 0.0  ;;  %v746_v51 = vadd.f32 %v745_v48, %v2855_v25  ;;  %v939_v52 = vadd.f32 %v938_v49, %v2857_v26  ;;  %v747_v53 = vpop.f32.mrb[39].mxu0  ;;  %v940_v54 = vpop.f32.mrb[39].mxu1  ;;  %1555 = vmatmul.mubr.bf16.gmra.mrb[96].mxu0 %v1163_v36  ;;  %1716 = vmatmul.mubr.bf16.gmra.mrb[96].mxu1 %v1165_v37  ;;  %v1075_v58 = vmax.f32 %v742_v42, 0.0 }
 0x1ab   : > { %v1078_v55 = vmax.f32 %v937_v47, 0.0  ;;  %v748_v56 = vadd.f32 %v747_v53, %v2859_v27  ;;  %v941_v57 = vadd.f32 %v940_v54, %v2861_v0  ;;  %v1076_v61 = vmax.f32 %v744_v46, 0.0 }
 0x1ac   : > { %v1079_v59 = vmax.f32 %v746_v51, 0.0  ;;  %v1081_v60 = vmax.f32 %v939_v52, 0.0 }
 0x1ad   : > { %v1080_v62 = vmax.f32 %v748_v56, 0.0  ;;  %v1082_v63 = vmax.f32 %v941_v57, 0.0 }
 0x1ae   : > { %v1167_v1 = vpack.c.bf16 %v1079_v59, %v1075_v58  ;;  %v1169_v2 = vpack.c.bf16 %v1081_v60, %v1077_v50 }
 0x1af   : > { %v1168_v3 = vpack.c.bf16 %v1080_v62, %v1076_v61  ;;  %v1170_v4 = vpack.c.bf16 %v1082_v63, %v1078_v55  ;;  %v751_v5 = vpop.f32.mrb[40].mxu0  ;;  %v944_v6 = vpop.f32.mrb[40].mxu1 }
 0x1b0   : > { %v752_v7 = vadd.f32 %v751_v5, %v2855_v25  ;;  %v945_v8 = vadd.f32 %v944_v6, %v2857_v26  ;;  %v753_v9 = vpop.f32.mrb[41].mxu0  ;;  %v946_v10 = vpop.f32.mrb[41].mxu1 }
 0x1b1   : > { %v754_v11 = vadd.f32 %v753_v9, %v2859_v27  ;;  %v947_v12 = vadd.f32 %v946_v10, %v2861_v0  ;;  %v755_v13 = vpop.f32.mrb[42].mxu0  ;;  %v948_v14 = vpop.f32.mrb[42].mxu1  ;;  %1562 = vmatprep.mubr.bf16.mxu0 %v1168_v3  ;;  %1723 = vmatprep.mubr.bf16.mxu1 %v1170_v4 }
 0x1b2   : > { %v1085_v15 = vmax.f32 %v945_v8, 0.0  ;;  %v756_v16 = vadd.f32 %v755_v13, %v2855_v25  ;;  %v949_v17 = vadd.f32 %v948_v14, %v2857_v26  ;;  %v757_v18 = vpop.f32.mrb[43].mxu0  ;;  %v950_v19 = vpop.f32.mrb[43].mxu1  ;;  %1563 = vmatmul.mubr.bf16.gmra.mrb[100].mxu0 %v1167_v1  ;;  %1724 = vmatmul.mubr.bf16.gmra.mrb[100].mxu1 %v1169_v2  ;;  %v1083_v23 = vmax.f32 %v752_v7, 0.0 }
 0x1b3   : > { %v1086_v20 = vmax.f32 %v947_v12, 0.0  ;;  %v758_v21 = vadd.f32 %v757_v18, %v2859_v27  ;;  %v951_v22 = vadd.f32 %v950_v19, %v2861_v0  ;;  %v1084_v29 = vmax.f32 %v754_v11, 0.0 }
 0x1b4   : > { %v1087_v24 = vmax.f32 %v756_v16, 0.0  ;;  %v1089_v28 = vmax.f32 %v949_v17, 0.0 }
 0x1b5   : > { %v1088_v30 = vmax.f32 %v758_v21, 0.0  ;;  %v1090_v31 = vmax.f32 %v951_v22, 0.0 }
 0x1b6   : > { %v1171_v32 = vpack.c.bf16 %v1087_v24, %v1083_v23  ;;  %v1173_v33 = vpack.c.bf16 %v1089_v28, %v1085_v15 }
 0x1b7   : > { %v1172_v34 = vpack.c.bf16 %v1088_v30, %v1084_v29  ;;  %v1174_v35 = vpack.c.bf16 %v1090_v31, %v1086_v20  ;;  %v761_v36 = vpop.f32.mrb[44].mxu0  ;;  %v954_v37 = vpop.f32.mrb[44].mxu1 }
 0x1b8   : > { %v762_v38 = vadd.f32 %v761_v36, %v2855_v25  ;;  %v955_v39 = vadd.f32 %v954_v37, %v2857_v26  ;;  %v763_v40 = vpop.f32.mrb[45].mxu0  ;;  %v956_v41 = vpop.f32.mrb[45].mxu1 }
 0x1b9   : > { %v764_v42 = vadd.f32 %v763_v40, %v2859_v27  ;;  %v957_v43 = vadd.f32 %v956_v41, %v2861_v0  ;;  %v765_v44 = vpop.f32.mrb[46].mxu0  ;;  %v958_v45 = vpop.f32.mrb[46].mxu1  ;;  %1570 = vmatprep.mubr.bf16.mxu0 %v1172_v34  ;;  %1731 = vmatprep.mubr.bf16.mxu1 %v1174_v35 }
 0x1ba   : > { %v1093_v46 = vmax.f32 %v955_v39, 0.0  ;;  %v766_v47 = vadd.f32 %v765_v44, %v2855_v25  ;;  %v959_v48 = vadd.f32 %v958_v45, %v2857_v26  ;;  %v767_v49 = vpop.f32.mrb[47].mxu0  ;;  %v960_v50 = vpop.f32.mrb[47].mxu1  ;;  %1571 = vmatmul.mubr.bf16.gmra.mrb[104].mxu0 %v1171_v32  ;;  %1732 = vmatmul.mubr.bf16.gmra.mrb[104].mxu1 %v1173_v33  ;;  %v1091_v54 = vmax.f32 %v762_v38, 0.0 }
 0x1bb   : > { %v1094_v51 = vmax.f32 %v957_v43, 0.0  ;;  %v768_v52 = vadd.f32 %v767_v49, %v2859_v27  ;;  %v961_v53 = vadd.f32 %v960_v50, %v2861_v0  ;;  %v1092_v57 = vmax.f32 %v764_v42, 0.0 }
 0x1bc   : > { %v1095_v55 = vmax.f32 %v766_v47, 0.0  ;;  %v1097_v56 = vmax.f32 %v959_v48, 0.0 }
 0x1bd   : > { %v1096_v58 = vmax.f32 %v768_v52, 0.0  ;;  %v1098_v59 = vmax.f32 %v961_v53, 0.0 }
 0x1be   : > { %v1175_v60 = vpack.c.bf16 %v1095_v55, %v1091_v54  ;;  %v1177_v61 = vpack.c.bf16 %v1097_v56, %v1093_v46 }
 0x1bf   : > { %v1176_v62 = vpack.c.bf16 %v1096_v58, %v1092_v57  ;;  %v1178_v63 = vpack.c.bf16 %v1098_v59, %v1094_v51  ;;  %v771_v1 = vpop.f32.mrb[48].mxu0  ;;  %v964_v2 = vpop.f32.mrb[48].mxu1 }
 0x1c0   : > { %v772_v3 = vadd.f32 %v771_v1, %v2855_v25  ;;  %v965_v4 = vadd.f32 %v964_v2, %v2857_v26  ;;  %v773_v5 = vpop.f32.mrb[49].mxu0  ;;  %v966_v6 = vpop.f32.mrb[49].mxu1 }
 0x1c1   : > { %v774_v7 = vadd.f32 %v773_v5, %v2859_v27  ;;  %v967_v8 = vadd.f32 %v966_v6, %v2861_v0  ;;  %v775_v9 = vpop.f32.mrb[50].mxu0  ;;  %v968_v10 = vpop.f32.mrb[50].mxu1  ;;  %1578 = vmatprep.mubr.bf16.mxu0 %v1176_v62  ;;  %1739 = vmatprep.mubr.bf16.mxu1 %v1178_v63 }
 0x1c2   : > { %v1101_v11 = vmax.f32 %v965_v4, 0.0  ;;  %v776_v12 = vadd.f32 %v775_v9, %v2855_v25  ;;  %v969_v13 = vadd.f32 %v968_v10, %v2857_v26  ;;  %v777_v14 = vpop.f32.mrb[51].mxu0  ;;  %v970_v15 = vpop.f32.mrb[51].mxu1  ;;  %1579 = vmatmul.mubr.bf16.gmra.mrb[108].mxu0 %v1175_v60  ;;  %1740 = vmatmul.mubr.bf16.gmra.mrb[108].mxu1 %v1177_v61  ;;  %v1099_v19 = vmax.f32 %v772_v3, 0.0 }
 0x1c3   : > { %v1102_v16 = vmax.f32 %v967_v8, 0.0  ;;  %v778_v17 = vadd.f32 %v777_v14, %v2859_v27  ;;  %v971_v18 = vadd.f32 %v970_v15, %v2861_v0  ;;  %v1100_v22 = vmax.f32 %v774_v7, 0.0 }
 0x1c4   : > { %v1103_v20 = vmax.f32 %v776_v12, 0.0  ;;  %v1105_v21 = vmax.f32 %v969_v13, 0.0 }
 0x1c5   : > { %v1104_v23 = vmax.f32 %v778_v17, 0.0  ;;  %v1106_v24 = vmax.f32 %v971_v18, 0.0 }
 0x1c6   : > { %v1179_v28 = vpack.c.bf16 %v1103_v20, %v1099_v19  ;;  %v1181_v29 = vpack.c.bf16 %v1105_v21, %v1101_v11 }
 0x1c7   : > { %v1180_v30 = vpack.c.bf16 %v1104_v23, %v1100_v22  ;;  %v1182_v31 = vpack.c.bf16 %v1106_v24, %v1102_v16  ;;  %v781_v32 = vpop.f32.mrb[52].mxu0  ;;  %v974_v33 = vpop.f32.mrb[52].mxu1 }
 0x1c8   : > { %v782_v34 = vadd.f32 %v781_v32, %v2855_v25  ;;  %v975_v35 = vadd.f32 %v974_v33, %v2857_v26  ;;  %v783_v36 = vpop.f32.mrb[53].mxu0  ;;  %v976_v37 = vpop.f32.mrb[53].mxu1 }
 0x1c9   : > { %v784_v38 = vadd.f32 %v783_v36, %v2859_v27  ;;  %v977_v39 = vadd.f32 %v976_v37, %v2861_v0  ;;  %v785_v40 = vpop.f32.mrb[54].mxu0  ;;  %v978_v41 = vpop.f32.mrb[54].mxu1  ;;  %1586 = vmatprep.mubr.bf16.mxu0 %v1180_v30  ;;  %1747 = vmatprep.mubr.bf16.mxu1 %v1182_v31 }
 0x1ca   : > { %v1109_v42 = vmax.f32 %v975_v35, 0.0  ;;  %v786_v43 = vadd.f32 %v785_v40, %v2855_v25  ;;  %v979_v44 = vadd.f32 %v978_v41, %v2857_v26  ;;  %v787_v45 = vpop.f32.mrb[55].mxu0  ;;  %v980_v46 = vpop.f32.mrb[55].mxu1  ;;  %1587 = vmatmul.mubr.bf16.gmra.mrb[112].mxu0 %v1179_v28  ;;  %1748 = vmatmul.mubr.bf16.gmra.mrb[112].mxu1 %v1181_v29  ;;  %v1107_v50 = vmax.f32 %v782_v34, 0.0 }
 0x1cb   : > { %v1110_v47 = vmax.f32 %v977_v39, 0.0  ;;  %v788_v48 = vadd.f32 %v787_v45, %v2859_v27  ;;  %v981_v49 = vadd.f32 %v980_v46, %v2861_v0  ;;  %v1108_v53 = vmax.f32 %v784_v38, 0.0 }
 0x1cc   : > { %v1111_v51 = vmax.f32 %v786_v43, 0.0  ;;  %v1113_v52 = vmax.f32 %v979_v44, 0.0 }
 0x1cd   : > { %v1112_v54 = vmax.f32 %v788_v48, 0.0  ;;  %v1114_v55 = vmax.f32 %v981_v49, 0.0 }
 0x1ce   : > { %v1183_v56 = vpack.c.bf16 %v1111_v51, %v1107_v50  ;;  %v1185_v57 = vpack.c.bf16 %v1113_v52, %v1109_v42 }
 0x1cf   : > { %v1184_v58 = vpack.c.bf16 %v1112_v54, %v1108_v53  ;;  %v1186_v59 = vpack.c.bf16 %v1114_v55, %v1110_v47  ;;  %v791_v60 = vpop.f32.mrb[56].mxu0  ;;  %v984_v61 = vpop.f32.mrb[56].mxu1 }
 0x1d0   : > { %v792_v62 = vadd.f32 %v791_v60, %v2855_v25  ;;  %v985_v63 = vadd.f32 %v984_v61, %v2857_v26  ;;  %v793_v1 = vpop.f32.mrb[57].mxu0  ;;  %v986_v2 = vpop.f32.mrb[57].mxu1 }
 0x1d1   : > { %v794_v3 = vadd.f32 %v793_v1, %v2859_v27  ;;  %v987_v4 = vadd.f32 %v986_v2, %v2861_v0  ;;  %v795_v5 = vpop.f32.mrb[58].mxu0  ;;  %v988_v6 = vpop.f32.mrb[58].mxu1  ;;  %1594 = vmatprep.mubr.bf16.mxu0 %v1184_v58  ;;  %1755 = vmatprep.mubr.bf16.mxu1 %v1186_v59 }
 0x1d2   : > { %v1117_v7 = vmax.f32 %v985_v63, 0.0  ;;  %v796_v8 = vadd.f32 %v795_v5, %v2855_v25  ;;  %v989_v9 = vadd.f32 %v988_v6, %v2857_v26  ;;  %v797_v10 = vpop.f32.mrb[59].mxu0  ;;  %v990_v11 = vpop.f32.mrb[59].mxu1  ;;  %1595 = vmatmul.mubr.bf16.gmra.mrb[116].mxu0 %v1183_v56  ;;  %1756 = vmatmul.mubr.bf16.gmra.mrb[116].mxu1 %v1185_v57  ;;  %v1115_v15 = vmax.f32 %v792_v62, 0.0 }
 0x1d3   : > { %v1118_v12 = vmax.f32 %v987_v4, 0.0  ;;  %v798_v13 = vadd.f32 %v797_v10, %v2859_v27  ;;  %v991_v14 = vadd.f32 %v990_v11, %v2861_v0  ;;  %v1116_v18 = vmax.f32 %v794_v3, 0.0 }
 0x1d4   : > { %v1119_v16 = vmax.f32 %v796_v8, 0.0  ;;  %v1121_v17 = vmax.f32 %v989_v9, 0.0 }
 0x1d5   : > { %v1120_v19 = vmax.f32 %v798_v13, 0.0  ;;  %v1122_v20 = vmax.f32 %v991_v14, 0.0 }
 0x1d6   : > { %v1187_v21 = vpack.c.bf16 %v1119_v16, %v1115_v15  ;;  %v1189_v22 = vpack.c.bf16 %v1121_v17, %v1117_v7 }
 0x1d7   : > { %v1188_v23 = vpack.c.bf16 %v1120_v19, %v1116_v18  ;;  %v1190_v24 = vpack.c.bf16 %v1122_v20, %v1118_v12  ;;  %v801_v28 = vpop.f32.mrb[60].mxu0  ;;  %v994_v29 = vpop.f32.mrb[60].mxu1 }
 0x1d8   : > { %v802_v30 = vadd.f32 %v801_v28, %v2855_v25  ;;  %v995_v31 = vadd.f32 %v994_v29, %v2857_v26  ;;  %v803_v32 = vpop.f32.mrb[61].mxu0  ;;  %v996_v33 = vpop.f32.mrb[61].mxu1 }
 0x1d9   : > { %v804_v34 = vadd.f32 %v803_v32, %v2859_v27  ;;  %v997_v35 = vadd.f32 %v996_v33, %v2861_v0  ;;  %v805_v36 = vpop.f32.mrb[62].mxu0  ;;  %v998_v37 = vpop.f32.mrb[62].mxu1  ;;  %1602 = vmatprep.mubr.bf16.mxu0 %v1188_v23  ;;  %1763 = vmatprep.mubr.bf16.mxu1 %v1190_v24 }
 0x1da   : > { %v1125_v38 = vmax.f32 %v995_v31, 0.0  ;;  %v806_v39 = vadd.f32 %v805_v36, %v2855_v25  ;;  %v999_v40 = vadd.f32 %v998_v37, %v2857_v26  ;;  %v807_v41 = vpop.f32.mrb[63].mxu0  ;;  %v1000_v42 = vpop.f32.mrb[63].mxu1  ;;  %1603 = vmatmul.mubr.bf16.gmra.mrb[120].mxu0 %v1187_v21  ;;  %1764 = vmatmul.mubr.bf16.gmra.mrb[120].mxu1 %v1189_v22  ;;  %v1123_v46 = vmax.f32 %v802_v30, 0.0 }
 0x1db   : > { %v1126_v43 = vmax.f32 %v997_v35, 0.0  ;;  %v808_v44 = vadd.f32 %v807_v41, %v2859_v27  ;;  %v1001_v45 = vadd.f32 %v1000_v42, %v2861_v0  ;;  %v1124_v49 = vmax.f32 %v804_v34, 0.0  ;;  %v2994_v27 = vld [vmem:[%s3118_s4] ss:$0 sm:$0xff] }
 0x1dc   : > { %v1127_v47 = vmax.f32 %v806_v39, 0.0  ;;  %v1129_v48 = vmax.f32 %v999_v40, 0.0 }
 0x1dd   : > { %v1128_v50 = vmax.f32 %v808_v44, 0.0  ;;  %v1130_v51 = vmax.f32 %v1001_v45, 0.0 }
 0x1de   : > { %v1191_v52 = vpack.c.bf16 %v1127_v47, %v1123_v46  ;;  %v1193_v25 = vpack.c.bf16 %v1129_v48, %v1125_v38 }
 0x1df   : > { %v1192_v53 = vpack.c.bf16 %v1128_v50, %v1124_v49  ;;  %v1194_v26 = vpack.c.bf16 %v1130_v51, %v1126_v43 }
 0x1e1   : > { %1610 = vmatprep.mubr.bf16.mxu0 %v1192_v53  ;;  %1771 = vmatprep.mubr.bf16.mxu1 %v1194_v26 }
 0x1e2   : > { %1611 = vmatmul.mubr.bf16.gmra.mrb[124].mxu0 %v1191_v52  ;;  %1772 = vmatmul.mubr.bf16.gmra.mrb[124].mxu1 %v1193_v25 }
 0x23d   : > { %v2035_v54 = vpop.f32.mrb[64].mxu0  ;;  %v2147_v55 = vpop.f32.mrb[64].mxu1 }
 0x23e   : > { %v2036_v0 = vpop.f32.mrb[65].mxu0  ;;  %v2148_v56 = vpop.f32.mrb[65].mxu1 }
 0x23f   : > { %v2037_v57 = vadd.f32 %v2036_v0, %v2035_v54  ;;  %v2149_v58 = vadd.f32 %v2148_v56, %v2147_v55  ;;  %v2038_v59 = vpop.f32.mrb[66].mxu0  ;;  %v2150_v60 = vpop.f32.mrb[66].mxu1 }
 0x240   : > { %v2039_v61 = vpop.f32.mrb[67].mxu0  ;;  %v2151_v62 = vpop.f32.mrb[67].mxu1 }
 0x241   : > { %v1493_v63 = vadd.f32 %v2037_v57, %v2994_v27  ;;  %v2040_v1 = vadd.f32 %v2039_v61, %v2038_v59  ;;  %v2152_v2 = vadd.f32 %v2151_v62, %v2150_v60 }
 0x243   : > { %v1654_v3 = vadd.f32 %v2149_v58, %v1493_v63  ;;  %v1496_v4 = vadd.f32 %v2040_v1, %v2994_v27 }
 0x245   : > { %1780 = vst [vmem:[%s2999_s28] sm:$0xff] %v1654_v3  ;;  %v1657_v5 = vadd.f32 %v2152_v2, %v1496_v4  ;;  %v2041_v6 = vpop.f32.mrb[68].mxu0  ;;  %v2153_v7 = vpop.f32.mrb[68].mxu1 }
 0x246   : > { %v2042_v8 = vpop.f32.mrb[69].mxu0  ;;  %v2154_v9 = vpop.f32.mrb[69].mxu1 }
 0x247   : > { %1781 = vst [vmem:[%s2999_s28 + $0x8] sm:$0xff] %v1657_v5  ;;  %v2043_v10 = vadd.f32 %v2042_v8, %v2041_v6  ;;  %v2155_v11 = vadd.f32 %v2154_v9, %v2153_v7  ;;  %v2044_v12 = vpop.f32.mrb[70].mxu0  ;;  %v2156_v13 = vpop.f32.mrb[70].mxu1 }
 0x248   : > { %v2045_v14 = vpop.f32.mrb[71].mxu0  ;;  %v2157_v15 = vpop.f32.mrb[71].mxu1 }
 0x249   : > { %v1501_v16 = vadd.f32 %v2043_v10, %v2994_v27  ;;  %v2046_v17 = vadd.f32 %v2045_v14, %v2044_v12  ;;  %v2158_v18 = vadd.f32 %v2157_v15, %v2156_v13 }
 0x24b   : > { %v1662_v19 = vadd.f32 %v2155_v11, %v1501_v16  ;;  %v1504_v20 = vadd.f32 %v2046_v17, %v2994_v27 }
 0x24d   : > { %1782 = vst [vmem:[%s2999_s28 + $0x10] sm:$0xff] %v1662_v19  ;;  %v1665_v21 = vadd.f32 %v2158_v18, %v1504_v20  ;;  %v2047_v22 = vpop.f32.mrb[72].mxu0  ;;  %v2159_v23 = vpop.f32.mrb[72].mxu1 }
 0x24e   : > { %v2048_v24 = vpop.f32.mrb[73].mxu0  ;;  %v2160_v28 = vpop.f32.mrb[73].mxu1 }
 0x24f   : > { %1783 = vst [vmem:[%s2999_s28 + $0x18] sm:$0xff] %v1665_v21  ;;  %v2049_v29 = vadd.f32 %v2048_v24, %v2047_v22  ;;  %v2161_v30 = vadd.f32 %v2160_v28, %v2159_v23  ;;  %v2050_v31 = vpop.f32.mrb[74].mxu0  ;;  %v2162_v32 = vpop.f32.mrb[74].mxu1 }
 0x250   : > { %v2051_v33 = vpop.f32.mrb[75].mxu0  ;;  %v2163_v34 = vpop.f32.mrb[75].mxu1 }
 0x251   : > { %v1509_v35 = vadd.f32 %v2049_v29, %v2994_v27  ;;  %v2052_v36 = vadd.f32 %v2051_v33, %v2050_v31  ;;  %v2164_v37 = vadd.f32 %v2163_v34, %v2162_v32 }
 0x253   : > { %v1670_v38 = vadd.f32 %v2161_v30, %v1509_v35  ;;  %v1512_v39 = vadd.f32 %v2052_v36, %v2994_v27 }
 0x255   : > { %1784 = vst [vmem:[%s2999_s28 + $0x20] sm:$0xff] %v1670_v38  ;;  %v1673_v40 = vadd.f32 %v2164_v37, %v1512_v39  ;;  %v2053_v41 = vpop.f32.mrb[76].mxu0  ;;  %v2165_v42 = vpop.f32.mrb[76].mxu1 }
 0x256   : > { %v2054_v43 = vpop.f32.mrb[77].mxu0  ;;  %v2166_v44 = vpop.f32.mrb[77].mxu1 }
 0x257   : > { %1785 = vst [vmem:[%s2999_s28 + $0x28] sm:$0xff] %v1673_v40  ;;  %v2055_v45 = vadd.f32 %v2054_v43, %v2053_v41  ;;  %v2167_v46 = vadd.f32 %v2166_v44, %v2165_v42  ;;  %v2056_v47 = vpop.f32.mrb[78].mxu0  ;;  %v2168_v48 = vpop.f32.mrb[78].mxu1 }
 0x258   : > { %v2057_v49 = vpop.f32.mrb[79].mxu0  ;;  %v2169_v50 = vpop.f32.mrb[79].mxu1 }
 0x259   : > { %v1517_v51 = vadd.f32 %v2055_v45, %v2994_v27  ;;  %v2058_v52 = vadd.f32 %v2057_v49, %v2056_v47  ;;  %v2170_v25 = vadd.f32 %v2169_v50, %v2168_v48 }
 0x25b   : > { %v1678_v53 = vadd.f32 %v2167_v46, %v1517_v51  ;;  %v1520_v26 = vadd.f32 %v2058_v52, %v2994_v27 }
 0x25d   : > { %1786 = vst [vmem:[%s2999_s28 + $0x30] sm:$0xff] %v1678_v53  ;;  %v1681_v54 = vadd.f32 %v2170_v25, %v1520_v26  ;;  %v2059_v55 = vpop.f32.mrb[80].mxu0  ;;  %v2171_v0 = vpop.f32.mrb[80].mxu1 }
 0x25e   : > { %v2060_v56 = vpop.f32.mrb[81].mxu0  ;;  %v2172_v57 = vpop.f32.mrb[81].mxu1 }
 0x25f   : > { %1787 = vst [vmem:[%s2999_s28 + $0x38] sm:$0xff] %v1681_v54  ;;  %v2061_v58 = vadd.f32 %v2060_v56, %v2059_v55  ;;  %v2173_v59 = vadd.f32 %v2172_v57, %v2171_v0  ;;  %v2062_v60 = vpop.f32.mrb[82].mxu0  ;;  %v2174_v61 = vpop.f32.mrb[82].mxu1 }
 0x260   : > { %v2063_v62 = vpop.f32.mrb[83].mxu0  ;;  %v2175_v63 = vpop.f32.mrb[83].mxu1 }
 0x261   : > { %v1525_v1 = vadd.f32 %v2061_v58, %v2994_v27  ;;  %v2064_v2 = vadd.f32 %v2063_v62, %v2062_v60  ;;  %v2176_v3 = vadd.f32 %v2175_v63, %v2174_v61 }
 0x263   : > { %v1686_v4 = vadd.f32 %v2173_v59, %v1525_v1  ;;  %v1528_v5 = vadd.f32 %v2064_v2, %v2994_v27 }
 0x265   : > { %1788 = vst [vmem:[%s2999_s28 + $0x40] sm:$0xff] %v1686_v4  ;;  %v1689_v6 = vadd.f32 %v2176_v3, %v1528_v5  ;;  %v2065_v7 = vpop.f32.mrb[84].mxu0  ;;  %v2177_v8 = vpop.f32.mrb[84].mxu1 }
 0x266   : > { %v2066_v9 = vpop.f32.mrb[85].mxu0  ;;  %v2178_v10 = vpop.f32.mrb[85].mxu1 }
 0x267   : > { %1789 = vst [vmem:[%s2999_s28 + $0x48] sm:$0xff] %v1689_v6  ;;  %v2067_v11 = vadd.f32 %v2066_v9, %v2065_v7  ;;  %v2179_v12 = vadd.f32 %v2178_v10, %v2177_v8  ;;  %v2068_v13 = vpop.f32.mrb[86].mxu0  ;;  %v2180_v14 = vpop.f32.mrb[86].mxu1 }
 0x268   : > { %v2069_v15 = vpop.f32.mrb[87].mxu0  ;;  %v2181_v16 = vpop.f32.mrb[87].mxu1 }
 0x269   : > { %v1533_v17 = vadd.f32 %v2067_v11, %v2994_v27  ;;  %v2070_v18 = vadd.f32 %v2069_v15, %v2068_v13  ;;  %v2182_v19 = vadd.f32 %v2181_v16, %v2180_v14 }
 0x26b   : > { %v1694_v20 = vadd.f32 %v2179_v12, %v1533_v17  ;;  %v1536_v21 = vadd.f32 %v2070_v18, %v2994_v27 }
 0x26d   : > { %1790 = vst [vmem:[%s2999_s28 + $0x50] sm:$0xff] %v1694_v20  ;;  %v1697_v22 = vadd.f32 %v2182_v19, %v1536_v21  ;;  %v2071_v23 = vpop.f32.mrb[88].mxu0  ;;  %v2183_v24 = vpop.f32.mrb[88].mxu1 }
 0x26e   : > { %v2072_v28 = vpop.f32.mrb[89].mxu0  ;;  %v2184_v29 = vpop.f32.mrb[89].mxu1 }
 0x26f   : > { %1791 = vst [vmem:[%s2999_s28 + $0x58] sm:$0xff] %v1697_v22  ;;  %v2073_v30 = vadd.f32 %v2072_v28, %v2071_v23  ;;  %v2185_v31 = vadd.f32 %v2184_v29, %v2183_v24  ;;  %v2074_v32 = vpop.f32.mrb[90].mxu0  ;;  %v2186_v33 = vpop.f32.mrb[90].mxu1 }
 0x270   : > { %v2075_v34 = vpop.f32.mrb[91].mxu0  ;;  %v2187_v35 = vpop.f32.mrb[91].mxu1 }
 0x271   : > { %v1541_v36 = vadd.f32 %v2073_v30, %v2994_v27  ;;  %v2076_v37 = vadd.f32 %v2075_v34, %v2074_v32  ;;  %v2188_v38 = vadd.f32 %v2187_v35, %v2186_v33 }
 0x273   : > { %v1702_v39 = vadd.f32 %v2185_v31, %v1541_v36  ;;  %v1544_v40 = vadd.f32 %v2076_v37, %v2994_v27 }
 0x275   : > { %1792 = vst [vmem:[%s2999_s28 + $0x60] sm:$0xff] %v1702_v39  ;;  %v1705_v41 = vadd.f32 %v2188_v38, %v1544_v40  ;;  %v2077_v42 = vpop.f32.mrb[92].mxu0  ;;  %v2189_v43 = vpop.f32.mrb[92].mxu1 }
 0x276   : > { %v2078_v44 = vpop.f32.mrb[93].mxu0  ;;  %v2190_v45 = vpop.f32.mrb[93].mxu1 }
 0x277   : > { %1793 = vst [vmem:[%s2999_s28 + $0x68] sm:$0xff] %v1705_v41  ;;  %v2079_v46 = vadd.f32 %v2078_v44, %v2077_v42  ;;  %v2191_v47 = vadd.f32 %v2190_v45, %v2189_v43  ;;  %v2080_v48 = vpop.f32.mrb[94].mxu0  ;;  %v2192_v49 = vpop.f32.mrb[94].mxu1 }
 0x278   : > { %v2081_v50 = vpop.f32.mrb[95].mxu0  ;;  %v2193_v51 = vpop.f32.mrb[95].mxu1 }
 0x279   : > { %v1549_v52 = vadd.f32 %v2079_v46, %v2994_v27  ;;  %v2082_v25 = vadd.f32 %v2081_v50, %v2080_v48  ;;  %v2194_v53 = vadd.f32 %v2193_v51, %v2192_v49 }
 0x27b   : > { %v1710_v26 = vadd.f32 %v2191_v47, %v1549_v52  ;;  %v1552_v54 = vadd.f32 %v2082_v25, %v2994_v27 }
 0x27d   : > { %1794 = vst [vmem:[%s2999_s28 + $0x70] sm:$0xff] %v1710_v26  ;;  %v1713_v55 = vadd.f32 %v2194_v53, %v1552_v54  ;;  %v2083_v0 = vpop.f32.mrb[96].mxu0  ;;  %v2195_v56 = vpop.f32.mrb[96].mxu1 }
 0x27e   : > { %v2084_v57 = vpop.f32.mrb[97].mxu0  ;;  %v2196_v58 = vpop.f32.mrb[97].mxu1 }
 0x27f   : > { %1795 = vst [vmem:[%s2999_s28 + $0x78] sm:$0xff] %v1713_v55  ;;  %v2085_v59 = vadd.f32 %v2084_v57, %v2083_v0  ;;  %v2197_v60 = vadd.f32 %v2196_v58, %v2195_v56  ;;  %v2086_v61 = vpop.f32.mrb[98].mxu0  ;;  %v2198_v62 = vpop.f32.mrb[98].mxu1 }
 0x280   : > { %v2087_v63 = vpop.f32.mrb[99].mxu0  ;;  %v2199_v1 = vpop.f32.mrb[99].mxu1 }
 0x281   : > { %v1557_v2 = vadd.f32 %v2085_v59, %v2994_v27  ;;  %v2088_v3 = vadd.f32 %v2087_v63, %v2086_v61  ;;  %v2200_v4 = vadd.f32 %v2199_v1, %v2198_v62 }
 0x283   : > { %v1718_v5 = vadd.f32 %v2197_v60, %v1557_v2  ;;  %v1560_v6 = vadd.f32 %v2088_v3, %v2994_v27 }
 0x285   : > { %1796 = vst [vmem:[%s2999_s28 + $0x80] sm:$0xff] %v1718_v5  ;;  %v1721_v7 = vadd.f32 %v2200_v4, %v1560_v6  ;;  %v2089_v8 = vpop.f32.mrb[100].mxu0  ;;  %v2201_v9 = vpop.f32.mrb[100].mxu1 }
 0x286   : > { %v2090_v10 = vpop.f32.mrb[101].mxu0  ;;  %v2202_v11 = vpop.f32.mrb[101].mxu1 }
 0x287   : > { %1797 = vst [vmem:[%s2999_s28 + $0x88] sm:$0xff] %v1721_v7  ;;  %v2091_v12 = vadd.f32 %v2090_v10, %v2089_v8  ;;  %v2203_v13 = vadd.f32 %v2202_v11, %v2201_v9  ;;  %v2092_v14 = vpop.f32.mrb[102].mxu0  ;;  %v2204_v15 = vpop.f32.mrb[102].mxu1 }
 0x288   : > { %v2093_v16 = vpop.f32.mrb[103].mxu0  ;;  %v2205_v17 = vpop.f32.mrb[103].mxu1 }
 0x289   : > { %v1565_v18 = vadd.f32 %v2091_v12, %v2994_v27  ;;  %v2094_v19 = vadd.f32 %v2093_v16, %v2092_v14  ;;  %v2206_v20 = vadd.f32 %v2205_v17, %v2204_v15 }
 0x28b   : > { %v1726_v21 = vadd.f32 %v2203_v13, %v1565_v18  ;;  %v1568_v22 = vadd.f32 %v2094_v19, %v2994_v27 }
 0x28d   : > { %1798 = vst [vmem:[%s2999_s28 + $0x90] sm:$0xff] %v1726_v21  ;;  %v1729_v23 = vadd.f32 %v2206_v20, %v1568_v22  ;;  %v2095_v24 = vpop.f32.mrb[104].mxu0  ;;  %v2207_v28 = vpop.f32.mrb[104].mxu1 }
 0x28e   : > { %v2096_v29 = vpop.f32.mrb[105].mxu0  ;;  %v2208_v30 = vpop.f32.mrb[105].mxu1 }
 0x28f   : > { %1799 = vst [vmem:[%s2999_s28 + $0x98] sm:$0xff] %v1729_v23  ;;  %v2097_v31 = vadd.f32 %v2096_v29, %v2095_v24  ;;  %v2209_v32 = vadd.f32 %v2208_v30, %v2207_v28  ;;  %v2098_v33 = vpop.f32.mrb[106].mxu0  ;;  %v2210_v34 = vpop.f32.mrb[106].mxu1 }
 0x290   : > { %v2099_v35 = vpop.f32.mrb[107].mxu0  ;;  %v2211_v36 = vpop.f32.mrb[107].mxu1 }
 0x291   : > { %v1573_v37 = vadd.f32 %v2097_v31, %v2994_v27  ;;  %v2100_v38 = vadd.f32 %v2099_v35, %v2098_v33  ;;  %v2212_v39 = vadd.f32 %v2211_v36, %v2210_v34 }
 0x293   : > { %v1734_v40 = vadd.f32 %v2209_v32, %v1573_v37  ;;  %v1576_v41 = vadd.f32 %v2100_v38, %v2994_v27 }
 0x295   : > { %1800 = vst [vmem:[%s2999_s28 + $0xa0] sm:$0xff] %v1734_v40  ;;  %v1737_v42 = vadd.f32 %v2212_v39, %v1576_v41  ;;  %v2101_v43 = vpop.f32.mrb[108].mxu0  ;;  %v2213_v44 = vpop.f32.mrb[108].mxu1 }
 0x296   : > { %v2102_v45 = vpop.f32.mrb[109].mxu0  ;;  %v2214_v46 = vpop.f32.mrb[109].mxu1 }
 0x297   : > { %1801 = vst [vmem:[%s2999_s28 + $0xa8] sm:$0xff] %v1737_v42  ;;  %v2103_v47 = vadd.f32 %v2102_v45, %v2101_v43  ;;  %v2215_v48 = vadd.f32 %v2214_v46, %v2213_v44  ;;  %v2104_v49 = vpop.f32.mrb[110].mxu0  ;;  %v2216_v50 = vpop.f32.mrb[110].mxu1 }
 0x298   : > { %v2105_v51 = vpop.f32.mrb[111].mxu0  ;;  %v2217_v52 = vpop.f32.mrb[111].mxu1 }
 0x299   : > { %v1581_v25 = vadd.f32 %v2103_v47, %v2994_v27  ;;  %v2106_v53 = vadd.f32 %v2105_v51, %v2104_v49  ;;  %v2218_v26 = vadd.f32 %v2217_v52, %v2216_v50 }
 0x29b   : > { %v1742_v54 = vadd.f32 %v2215_v48, %v1581_v25  ;;  %v1584_v55 = vadd.f32 %v2106_v53, %v2994_v27 }
 0x29d   : > { %1802 = vst [vmem:[%s2999_s28 + $0xb0] sm:$0xff] %v1742_v54  ;;  %v1745_v0 = vadd.f32 %v2218_v26, %v1584_v55  ;;  %v2107_v56 = vpop.f32.mrb[112].mxu0  ;;  %v2219_v57 = vpop.f32.mrb[112].mxu1 }
 0x29e   : > { %v2108_v58 = vpop.f32.mrb[113].mxu0  ;;  %v2220_v59 = vpop.f32.mrb[113].mxu1 }
 0x29f   : > { %1803 = vst [vmem:[%s2999_s28 + $0xb8] sm:$0xff] %v1745_v0  ;;  %v2109_v60 = vadd.f32 %v2108_v58, %v2107_v56  ;;  %v2221_v61 = vadd.f32 %v2220_v59, %v2219_v57  ;;  %v2110_v62 = vpop.f32.mrb[114].mxu0  ;;  %v2222_v63 = vpop.f32.mrb[114].mxu1 }
 0x2a0   : > { %v2111_v1 = vpop.f32.mrb[115].mxu0  ;;  %v2223_v2 = vpop.f32.mrb[115].mxu1 }
 0x2a1   : > { %v1589_v3 = vadd.f32 %v2109_v60, %v2994_v27  ;;  %v2112_v4 = vadd.f32 %v2111_v1, %v2110_v62  ;;  %v2224_v5 = vadd.f32 %v2223_v2, %v2222_v63 }
 0x2a3   : > { %v1750_v6 = vadd.f32 %v2221_v61, %v1589_v3  ;;  %v1592_v7 = vadd.f32 %v2112_v4, %v2994_v27 }
 0x2a5   : > { %1804 = vst [vmem:[%s2999_s28 + $0xc0] sm:$0xff] %v1750_v6  ;;  %v1753_v8 = vadd.f32 %v2224_v5, %v1592_v7  ;;  %v2113_v9 = vpop.f32.mrb[116].mxu0  ;;  %v2225_v10 = vpop.f32.mrb[116].mxu1 }
 0x2a6   : > { %v2114_v11 = vpop.f32.mrb[117].mxu0  ;;  %v2226_v12 = vpop.f32.mrb[117].mxu1 }
 0x2a7   : > { %1805 = vst [vmem:[%s2999_s28 + $0xc8] sm:$0xff] %v1753_v8  ;;  %v2115_v13 = vadd.f32 %v2114_v11, %v2113_v9  ;;  %v2227_v14 = vadd.f32 %v2226_v12, %v2225_v10  ;;  %v2116_v15 = vpop.f32.mrb[118].mxu0  ;;  %v2228_v16 = vpop.f32.mrb[118].mxu1 }
 0x2a8   : > { %v2117_v17 = vpop.f32.mrb[119].mxu0  ;;  %v2229_v18 = vpop.f32.mrb[119].mxu1 }
 0x2a9   : > { %v1597_v19 = vadd.f32 %v2115_v13, %v2994_v27  ;;  %v2118_v20 = vadd.f32 %v2117_v17, %v2116_v15  ;;  %v2230_v21 = vadd.f32 %v2229_v18, %v2228_v16 }
 0x2ab   : > { %v1758_v22 = vadd.f32 %v2227_v14, %v1597_v19  ;;  %v1600_v23 = vadd.f32 %v2118_v20, %v2994_v27 }
 0x2ad   : > { %1806 = vst [vmem:[%s2999_s28 + $0xd0] sm:$0xff] %v1758_v22  ;;  %v1761_v24 = vadd.f32 %v2230_v21, %v1600_v23  ;;  %v2119_v28 = vpop.f32.mrb[120].mxu0  ;;  %v2231_v29 = vpop.f32.mrb[120].mxu1 }
 0x2ae   : > { %v2120_v30 = vpop.f32.mrb[121].mxu0  ;;  %v2232_v31 = vpop.f32.mrb[121].mxu1 }
 0x2af   : > { %1807 = vst [vmem:[%s2999_s28 + $0xd8] sm:$0xff] %v1761_v24  ;;  %v2121_v32 = vadd.f32 %v2120_v30, %v2119_v28  ;;  %v2233_v33 = vadd.f32 %v2232_v31, %v2231_v29  ;;  %v2122_v34 = vpop.f32.mrb[122].mxu0  ;;  %v2234_v35 = vpop.f32.mrb[122].mxu1 }
 0x2b0   : > { %v2123_v36 = vpop.f32.mrb[123].mxu0  ;;  %v2235_v37 = vpop.f32.mrb[123].mxu1 }
 0x2b1   : > { %v1605_v38 = vadd.f32 %v2121_v32, %v2994_v27  ;;  %v2124_v39 = vadd.f32 %v2123_v36, %v2122_v34  ;;  %v2236_v40 = vadd.f32 %v2235_v37, %v2234_v35 }
 0x2b3   : > { %v1766_v41 = vadd.f32 %v2233_v33, %v1605_v38  ;;  %v1608_v42 = vadd.f32 %v2124_v39, %v2994_v27 }
 0x2b5   : > { %1808 = vst [vmem:[%s2999_s28 + $0xe0] sm:$0xff] %v1766_v41  ;;  %v1769_v43 = vadd.f32 %v2236_v40, %v1608_v42  ;;  %v2125_v44 = vpop.f32.mrb[124].mxu0  ;;  %v2237_v45 = vpop.f32.mrb[124].mxu1 }
 0x2b6   : > { %v2126_v46 = vpop.f32.mrb[125].mxu0  ;;  %v2238_v47 = vpop.f32.mrb[125].mxu1 }
 0x2b7   : > { %1809 = vst [vmem:[%s2999_s28 + $0xe8] sm:$0xff] %v1769_v43  ;;  %v2127_v48 = vadd.f32 %v2126_v46, %v2125_v44  ;;  %v2239_v49 = vadd.f32 %v2238_v47, %v2237_v45  ;;  %v2128_v50 = vpop.f32.mrb[126].mxu0  ;;  %v2240_v51 = vpop.f32.mrb[126].mxu1 }
 0x2b8   : > { %v2129_v52 = vpop.f32.mrb[127].mxu0  ;;  %v2241_v25 = vpop.f32.mrb[127].mxu1 }
 0x2b9   : > { %v1613_v53 = vadd.f32 %v2127_v48, %v2994_v27  ;;  %v2130_v26 = vadd.f32 %v2129_v52, %v2128_v50  ;;  %v2242_v54 = vadd.f32 %v2241_v25, %v2240_v51 }
 0x2bb   : > { %v1774_v55 = vadd.f32 %v2239_v49, %v1613_v53  ;;  %v1616_v0 = vadd.f32 %v2130_v26, %v2994_v27 }
 0x2bd   : > { %1810 = vst [vmem:[%s2999_s28 + $0xf0] sm:$0xff] %v1774_v55  ;;  %v1777_v56 = vadd.f32 %v2242_v54, %v1616_v0 }
 0x2bf   : > { %1811 = vst [vmem:[%s2999_s28 + $0xf8] sm:$0xff] %v1777_v56 }
 0x2c0   : > { %2512 = shalt.err (!%p2509_p2)
}
 0x2c1   : > { %s2513_s24 = scalar_lea.hbm %s3066_s23, 4096  ;;  %s2517_s13 = scalar_lea.hbm %s3119_s5, 8192 }
 0x2c2   : > { %p2514_p13 = scmp.ne.s32.totalorder %s3066_s23, %s2513_s24  ;;  %p2518_p4 = scmp.lt.u32.totalorder %s3066_s23, %s3119_s5 }
 0x2c3   : > { %p2519_p7 = scmp.lt.u32.totalorder %s2517_s13, %s2513_s24  ;;  %p2521_p11 = scmp.lt.u32.totalorder %s2513_s24, %s3066_s23 }
 0x2c4   : > { %p2515_p6 = pnand %p2514_p13, %p3133_p0 }
 0x2c5   : > { %p2520_p8 = por %p2519_p7, %p2518_p4 }
 0x2c6   : > { %p2516_p10 = pneg %p2515_p6 }
 0x2c7   : > { %p2522_p1 = por %p2521_p11, %p2520_p8 }
 0x2c9   : > { %p2523_p3 = pnand %p2522_p1, %p2516_p10 }
 0x2cb   : > { %2526 = shalt.err (!%p2523_p3)
}
 0x2cc   : > { %s2580_s14 = smov 128   ;;  %s2581_s30 = smov 8  }
 0x2cd   : > { %2253 = dma.vmem_to_hbm [thread:$0]  (%p3133_p0), %s3068_s15, 4096, %s3066_s23, %s1813_s7, %s2580_s14, %s2580_s14, %s2581_s30  }
 0x2ce PF: > { %s1841_s11 = sand.u32 1, %s2557_s18   ;;  %p3134_p5 = scmp.ne.s32.totalorder %s3124_s25, 0 }
 0x2cf   : > { %p3135_p9 = scmp.ge.s32.totalorder %s2569_s21, 2  ;;  %s1842_s6 = scalar_lea.sflag [#allocation4], %s1841_s11 }
 0x2d1   : > { %p2267_p12 = pnand %p3135_p9, %p3134_p5 }
 0x2d3   : > { %2552 = dma.done.wait (!%p2267_p12), %s1842_s6, 4096  }
 0x2d4   : > { %2554 = vsyncadd (!%p2267_p12), %s1842_s6, 4294963200  ;;  %p19_p2 = scmp.ge.s32.totalorder %s2725_s16, 4   ;;  %s3136_s18 = smov %s2561_s19 }
 0x2d5   : > { %s3137_s19 = smov %s2565_s20  ;;  %s3138_s20 = smov %s2734_s27 }
 0x2d6   : > { %s3139_s21 = smov %s2725_s16  ;;  %21 = sbr.rel (!%p19_p2) target bundleno = 6 (0x6), region = 93 }
 0x2dd   :  { %1847 = vsyncpa [#allocation3], 1 }
 0x2de   :  { %1849 = vsyncpa [#allocation3 + $0x1], 1 }
 0x2df   :  { %1850 = vsyncpa [#allocation6], 1 }
 0x2e0   :  { %1851 = vsyncpa [#allocation4], 1 }
 0x2e1   :  { %1853 = vsyncpa [#allocation4 + $0x1], 1 }

</bundles_post_ra>
